<compile_context>
chip_gen: v6e
topology: v6e:2x2x1
jax: 0.10.0
libtpu: 0.0.40
codegen_flags: <defaults>
</compile_context>

<pallas_src>
import functools

import jax
import jax.numpy as jnp
from jax import lax
from jax.experimental import pallas as pl
from jax.experimental.pallas import tpu as pltpu

ALPHA = 15.0
BETA = 10.0
EP = 0.0


def _round_up(x, m):
    return ((x + m - 1) // m) * m


def _hhea_loss_kernel(left_ref, right_ref, out_ref,
                      lhs_ref, rowsum_ref, acc_ref,
                      *, alpha, beta, ep, n_valid, n_pad, tn,
                      use_bf16_exp, use_bf16_matmul):
    j = pl.program_id(0)
    inv_alpha = 1.0 / alpha

    # --- one-time init: normalize + alpha-fold the left side, zero carries ---
    @pl.when(j == 0)
    def _init():
        l = left_ref[...].astype(jnp.float32)                      # (N_pad, D)
        # F.normalize(x, p=2, dim=1, eps=1e-12): x / max(||x||, 1e-12)
        inv_norm = lax.rsqrt(
            jnp.maximum(jnp.sum(l * l, axis=-1, keepdims=True), 1e-24))
        lhs_ref[...] = (alpha * inv_norm) * l                      # alpha * l_n
        rowsum_ref[...] = jnp.zeros_like(rowsum_ref)
        acc_ref[0] = jnp.float32(0.0)

    # --- normalize this column strip of the right side (rows seen once) -----
    r = right_ref[...].astype(jnp.float32)                         # (Tn, D)
    r_inv = lax.rsqrt(
        jnp.maximum(jnp.sum(r * r, axis=-1, keepdims=True), 1e-24))
    r_n = r * r_inv                                                 # (Tn, D)

    lhs = lhs_ref[...]                                              # (N_pad, D)

    # --- (N_pad, Tn) strip of alpha * S on the MXU --------------------------
    dn = (((1,), (1,)), ((), ()))
    if use_bf16_matmul:
        s = lax.dot_general(lhs.astype(jnp.bfloat16), r_n.astype(jnp.bfloat16),
                            dimension_numbers=dn,
                            preferred_element_type=jnp.float32)
    else:
        s = lax.dot_general(lhs, r_n, dimension_numbers=dn,
                            preferred_element_type=jnp.float32)
    if ep != 0.0:  # ep == 0 default folded statically
        s = s - (alpha * ep)

    # --- diagonal + padding mask (VPU compare/select; EUP is the bottleneck)
    row_id = lax.broadcasted_iota(jnp.int32, (n_pad, tn), 0)
    col_id = lax.broadcasted_iota(jnp.int32, (n_pad, tn), 1) + j * tn
    valid = row_id != col_id
    if n_valid != n_pad:
        valid = valid & (row_id < n_valid) & (col_id < n_valid)

    if use_bf16_exp:  # v6e/v7x only lever; ~1e-3-level relative error
        e = jnp.exp(s.astype(jnp.bfloat16)).astype(jnp.float32)
    else:
        e = jnp.exp(s)
    e = jnp.where(valid, e, 0.0)                                    # (N_pad, Tn)

    # --- accumulate row sums (carry), finish column term for this strip -----
    rowsum_ref[...] += jnp.sum(e, axis=1, keepdims=True)            # (N_pad, 1)

    col_sum = jnp.sum(e, axis=0, keepdims=True)                     # (1, Tn)
    # padded / masked columns have col_sum == 0 -> log(1+0) == 0, no extra mask
    col_term = jnp.sum(jnp.log(1.0 + col_sum)) * inv_alpha

    # diag(S) for this strip's indices via O(Tn*D) elementwise product
    # (no eye mask, no per-strip masked cross-sublane reduce).
    lstart = pl.multiple_of(j * tn, tn)
    l_strip = lhs_ref[pl.ds(lstart, tn), :]                         # (Tn, D)
    diag_s = jnp.sum(l_strip * r_n, axis=-1, keepdims=True) * inv_alpha  # (Tn,1)
    # padded rows are all-zero -> diag_s == 0 -> log(1+relu(0)) == 0
    diag_term = -beta * jnp.sum(jnp.log(1.0 + jnp.maximum(diag_s, 0.0)))

    acc_ref[0] = acc_ref[0] + col_term + diag_term

    # --- finalize: row term + mean ------------------------------------------
    @pl.when(j == pl.num_programs(0) - 1)
    def _fin():
        row_term = jnp.sum(jnp.log(1.0 + rowsum_ref[...])) * inv_alpha
        out_ref[0, 0] = (acc_ref[0] + row_term) * jnp.float32(1.0 / n_valid)


def hhea_loss(pairs, features, *, alpha=ALPHA, beta=BETA, ep=EP,
              use_bf16_exp=False, use_bf16_matmul=False):
    """pairs: (N, 2) int32 entity-index pairs; features: (num_entities, dim)."""
    pairs = jnp.asarray(pairs, dtype=jnp.int32)
    left = features[pairs[:, 0]]     # glue: row gather in plain JAX (see TODO)
    right = features[pairs[:, 1]]
    n, d = left.shape

    # Lane-dense column-strip width: multiple of 128, shrunk so one strip's
    # f32 temporaries stay comfortably inside scoped VMEM.
    tn = min(512, _round_up(n, 128))
    while tn > 128 and 3 * _round_up(n, tn) * tn * 4 > (24 << 20):
        tn //= 2
    n_pad = _round_up(n, tn)
    if n_pad != n:
        left = jnp.pad(left, ((0, n_pad - n), (0, 0)))
        right = jnp.pad(right, ((0, n_pad - n), (0, 0)))
    num_strips = n_pad // tn

    kernel = functools.partial(
        _hhea_loss_kernel,
        alpha=float(alpha), beta=float(beta), ep=float(ep),
        n_valid=int(n), n_pad=int(n_pad), tn=int(tn),
        use_bf16_exp=bool(use_bf16_exp), use_bf16_matmul=bool(use_bf16_matmul))

    # VMEM high-water estimate: double-buffered inputs + f32 scratches + strip
    # temporaries.  Only raise the scoped limit when actually needed, and clamp
    # against the physical capacity of the current chip (v7x has 64 MiB).
    ib = jnp.dtype(left.dtype).itemsize
    est_vmem = ((2 * n_pad * d + 2 * tn * d) * ib
                + (n_pad * d + n_pad * 128 + 3 * n_pad * tn) * 4)
    params = {"dimension_semantics": ("arbitrary",)}
    if est_vmem > (16 << 20):
        try:
            cap = int(pltpu.get_tpu_info().vmem_capacity_bytes)
        except Exception:
            cap = 64 << 20  # most conservative generation (v7x)
        params["vmem_limit_bytes"] = int(min(est_vmem * 5 // 4, cap * 85 // 100))
    compiler_params = pltpu.CompilerParams(**params)

    out = pl.pallas_call(
        kernel,
        out_shape=jax.ShapeDtypeStruct((1, 1), jnp.float32),
        grid_spec=pltpu.PrefetchScalarGridSpec(
            num_scalar_prefetch=0,
            grid=(num_strips,),
            in_specs=[
                # left: constant block index -> DMA'd once, resident in VMEM
                pl.BlockSpec((n_pad, d), lambda j: (0, 0)),
                # right: one lane-dense column strip of rows per grid step
                pl.BlockSpec((tn, d), lambda j: (j, 0)),
            ],
            # scalar reduction result lives in SMEM (no masked 1-elem VMEM vst)
            out_specs=pl.BlockSpec(memory_space=pltpu.MemorySpace.SMEM),
            scratch_shapes=[
                pltpu.VMEM((n_pad, d), jnp.float32),   # alpha-folded normalized left
                pltpu.VMEM((n_pad, 1), jnp.float32),   # row-sum carry
                pltpu.SMEM((1,), jnp.float32),         # col/diag scalar carry
            ],
        ),
        compiler_params=compiler_params,
    )(left, right)
    return out[0, 0]


def _hhea_loss_ref(pairs, features, alpha=ALPHA, beta=BETA, ep=EP):
    """Pure-JAX reference mirroring the PyTorch forward."""
    emb = features / jnp.maximum(
        jnp.linalg.norm(features, axis=1, keepdims=True), 1e-12)
    l = emb[pairs[:, 0]]
    r = emb[pairs[:, 1]]
    scores = l @ r.T
    n = scores.shape[0]
    eye = jnp.eye(n, dtype=bool)
    e = jnp.where(eye, 0.0, jnp.exp(alpha * (scores - ep)))
    loss_diag = -jnp.log(1.0 + jnp.maximum(jnp.diag(scores), 0.0))
    return jnp.sum(jnp.log(1.0 + e.sum(0)) / alpha
                   + jnp.log(1.0 + e.sum(1)) / alpha
                   + beta * loss_diag) / n


if __name__ == "__main__":
    key = jax.random.PRNGKey(0)
    k_feat, k_perm = jax.random.split(key)

    num_entities, dim, n_pairs = 64, 32, 8
    features = jax.random.normal(k_feat, (num_entities, dim), dtype=jnp.float32)
    left_ids = jax.random.permutation(k_perm, num_entities)[:n_pairs]
    right_ids = (left_ids + num_entities // 2) % num_entities
    pairs = jnp.stack([left_ids, right_ids], axis=1).astype(jnp.int32)

    loss = jax.block_until_ready(hhea_loss(pairs, features))
    ref = _hhea_loss_ref(pairs, features)
    assert jnp.allclose(loss, ref, rtol=1e-4, atol=1e-5), (loss, ref)
    print("KERNEL_OK")
</pallas_src>

<mosaic_0001>
module attributes {stable_mosaic.version = 11 : i64} {
  func.func @_hhea_loss_kernel(%arg0: i32, %arg1: memref<128x32xf32, #tpu.memory_space<vmem>>, %arg2: memref<128x32xf32, #tpu.memory_space<vmem>>, %arg3: memref<1x1xf32, #tpu.memory_space<smem>>, %arg4: memref<128x32xf32, #tpu.memory_space<vmem>>, %arg5: memref<128x1xf32, #tpu.memory_space<vmem>>, %arg6: memref<1xf32, #tpu.memory_space<smem>>) attributes {dimension_semantics = [#tpu.dimension_semantics<arbitrary>], iteration_bounds = array<i64: 1>, scalar_prefetch = 0 : i64, scratch_operands = 3 : i64, tpu.core_type = #tpu.core_type<tc>, window_params = [{pipeline_mode = #tpu.pipeline_mode<synchronous>, transform_indices = @transform_0, window_bounds = array<i64: 128, 32>}, {transform_indices = @transform_1, window_bounds = array<i64: 128, 32>}, {transform_indices = @transform_2, window_bounds = array<i64: 1, 1>}]} {
    %c0_i32 = arith.constant 0 : i32
    %0 = arith.cmpi eq, %arg0, %c0_i32 : i32
    %1 = arith.extui %0 : i1 to i32
    %c0_i32_0 = arith.constant 0 : i32
    %2 = arith.cmpi ne, %1, %c0_i32_0 : i32
    scf.if %2 {
      %c0_29 = arith.constant 0 : index
      %c0_30 = arith.constant 0 : index
      %70 = vector.load %arg1[%c0_29, %c0_30] : memref<128x32xf32, #tpu.memory_space<vmem>>, vector<128x32xf32>
      %71 = arith.mulf %70, %70 : vector<128x32xf32>
      %cst_31 = arith.constant dense<0.000000e+00> : vector<128xf32>
      %72 = vector.multi_reduction <add>, %71, %cst_31 [1] : vector<128x32xf32> to vector<128xf32>
      %73 = vector.shape_cast %72 : vector<128xf32> to vector<128x1xf32>
      %cst_32 = arith.constant 1.000000e-24 : f32
      %74 = vector.broadcast %cst_32 : f32 to vector<128x1xf32>
      %75 = arith.maximumf %73, %74 : vector<128x1xf32>
      %76 = math.rsqrt %75 : vector<128x1xf32>
      %cst_33 = arith.constant 1.500000e+01 : f32
      %77 = vector.broadcast %cst_33 : f32 to vector<128x1xf32>
      %78 = arith.mulf %77, %76 : vector<128x1xf32>
      %79 = vector.broadcast %78 : vector<128x1xf32> to vector<128x32xf32>
      %80 = arith.mulf %79, %70 : vector<128x32xf32>
      %c0_34 = arith.constant 0 : index
      %c0_35 = arith.constant 0 : index
      %81 = vector.load %arg4[%c0_34, %c0_35] : memref<128x32xf32, #tpu.memory_space<vmem>>, vector<128x32xf32>
      tpu.vector_store %arg4[%c0_34, %c0_35], %80 {strides = array<i32>} : memref<128x32xf32, #tpu.memory_space<vmem>>, vector<128x32xf32>,
      %cst_36 = arith.constant 0.000000e+00 : f32
      %82 = vector.broadcast %cst_36 : f32 to vector<128x1xf32>
      %c0_37 = arith.constant 0 : index
      %c0_38 = arith.constant 0 : index
      %83 = vector.load %arg5[%c0_37, %c0_38] : memref<128x1xf32, #tpu.memory_space<vmem>>, vector<128x1xf32>
      tpu.vector_store %arg5[%c0_37, %c0_38], %82 {strides = array<i32>} : memref<128x1xf32, #tpu.memory_space<vmem>>, vector<128x1xf32>,
      %cst_39 = arith.constant 0.000000e+00 : f32
      %c0_40 = arith.constant 0 : index
      %84 = memref.load %arg6[%c0_40] : memref<1xf32, #tpu.memory_space<smem>>
      memref.store %cst_39, %arg6[%c0_40] : memref<1xf32, #tpu.memory_space<smem>>
    } else {
    }
    %c0 = arith.constant 0 : index
    %c0_1 = arith.constant 0 : index
    %3 = vector.load %arg2[%c0, %c0_1] : memref<128x32xf32, #tpu.memory_space<vmem>>, vector<128x32xf32>
    %4 = arith.mulf %3, %3 : vector<128x32xf32>
    %cst = arith.constant dense<0.000000e+00> : vector<128xf32>
    %5 = vector.multi_reduction <add>, %4, %cst [1] : vector<128x32xf32> to vector<128xf32>
    %6 = vector.shape_cast %5 : vector<128xf32> to vector<128x1xf32>
    %cst_2 = arith.constant 1.000000e-24 : f32
    %7 = vector.broadcast %cst_2 : f32 to vector<128x1xf32>
    %8 = arith.maximumf %6, %7 : vector<128x1xf32>
    %9 = math.rsqrt %8 : vector<128x1xf32>
    %10 = vector.broadcast %9 : vector<128x1xf32> to vector<128x32xf32>
    %11 = arith.mulf %3, %10 : vector<128x32xf32>
    %c0_3 = arith.constant 0 : index
    %c0_4 = arith.constant 0 : index
    %12 = vector.load %arg4[%c0_3, %c0_4] : memref<128x32xf32, #tpu.memory_space<vmem>>, vector<128x32xf32>
    %cst_5 = arith.constant dense<0.000000e+00> : vector<128x128xf32>
    %13 = tpu.matmul %12, %11, %cst_5 {dimension_numbers = #tpu.dot_dimension_numbers<[1], [1], [0], [0], [0, 0, 1, 0], [], []>} : vector<128x32xf32>, vector<128x32xf32>, vector<128x128xf32> -> vector<128x128xf32>
    %14 = tpu.iota {dimensions = array<i32: 0>} : vector<128x128xi32>
    %15 = tpu.iota {dimensions = array<i32: 1>} : vector<128x128xi32>
    %c128_i32 = arith.constant 128 : i32
    %16 = arith.muli %arg0, %c128_i32 : i32
    %17 = vector.broadcast %16 : i32 to vector<128x128xi32>
    %18 = arith.addi %15, %17 : vector<128x128xi32>
    %19 = arith.cmpi ne, %14, %18 : vector<128x128xi32>
    %c8_i32 = arith.constant 8 : i32
    %20 = vector.broadcast %c8_i32 : i32 to vector<128x128xi32>
    %21 = arith.cmpi slt, %14, %20 : vector<128x128xi32>
    %22 = arith.andi %19, %21 : vector<128x128xi1>
    %c8_i32_6 = arith.constant 8 : i32
    %23 = vector.broadcast %c8_i32_6 : i32 to vector<128x128xi32>
    %24 = arith.cmpi slt, %18, %23 : vector<128x128xi32>
    %25 = arith.andi %22, %24 : vector<128x128xi1>
    %26 = math.exp %13 : vector<128x128xf32>
    %cst_7 = arith.constant 0.000000e+00 : f32
    %27 = vector.broadcast %cst_7 : f32 to vector<128x128xf32>
    %28 = arith.select %25, %26, %27 : vector<128x128xi1>, vector<128x128xf32>
    %c0_8 = arith.constant 0 : index
    %c0_9 = arith.constant 0 : index
    %29 = vector.load %arg5[%c0_8, %c0_9] : memref<128x1xf32, #tpu.memory_space<vmem>>, vector<128x1xf32>
    %cst_10 = arith.constant dense<0.000000e+00> : vector<128xf32>
    %30 = vector.multi_reduction <add>, %28, %cst_10 [1] : vector<128x128xf32> to vector<128xf32>
    %31 = vector.shape_cast %30 : vector<128xf32> to vector<128x1xf32>
    %32 = arith.addf %29, %31 : vector<128x1xf32>
    %c0_11 = arith.constant 0 : index
    %c0_12 = arith.constant 0 : index
    %33 = vector.load %arg5[%c0_11, %c0_12] : memref<128x1xf32, #tpu.memory_space<vmem>>, vector<128x1xf32>
    tpu.vector_store %arg5[%c0_11, %c0_12], %32 {strides = array<i32>} : memref<128x1xf32, #tpu.memory_space<vmem>>, vector<128x1xf32>,
    %cst_13 = arith.constant dense<0.000000e+00> : vector<128xf32>
    %34 = vector.multi_reduction <add>, %28, %cst_13 [0] : vector<128x128xf32> to vector<128xf32>
    %35 = vector.shape_cast %34 : vector<128xf32> to vector<1x128xf32>
    %cst_14 = arith.constant 1.000000e+00 : f32
    %36 = vector.broadcast %cst_14 : f32 to vector<1x128xf32>
    %37 = arith.addf %36, %35 : vector<1x128xf32>
    %38 = math.log %37 : vector<1x128xf32>
    %39 = vector.shape_cast %38 : vector<1x128xf32> to vector<1x1x128xf32>
    %cst_15 = arith.constant dense<0.000000e+00> : vector<1xf32>
    %40 = vector.multi_reduction <add>, %39, %cst_15 [1, 2] : vector<1x1x128xf32> to vector<1xf32>
    %41 = vector.shape_cast %40 : vector<1xf32> to vector<1x1x1xf32>
    %42 = vector.extract %41[0, 0, 0] : f32 from vector<1x1x1xf32>
    %cst_16 = arith.constant 0.0666666701 : f32
    %43 = arith.mulf %42, %cst_16 : f32
    %c128_i32_17 = arith.constant 128 : i32
    %44 = arith.muli %arg0, %c128_i32_17 : i32
    %45 = tpu.assume_multiple %44, 128 : i32
    %46 = arith.index_cast %45 : i32 to index
    %c0_18 = arith.constant 0 : index
    %47 = vector.load %arg4[%46, %c0_18] : memref<128x32xf32, #tpu.memory_space<vmem>>, vector<128x32xf32>
    %48 = arith.mulf %47, %11 : vector<128x32xf32>
    %cst_19 = arith.constant dense<0.000000e+00> : vector<128xf32>
    %49 = vector.multi_reduction <add>, %48, %cst_19 [1] : vector<128x32xf32> to vector<128xf32>
    %50 = vector.shape_cast %49 : vector<128xf32> to vector<128x1xf32>
    %cst_20 = arith.constant 0.0666666701 : f32
    %51 = vector.broadcast %cst_20 : f32 to vector<128x1xf32>
    %52 = arith.mulf %50, %51 : vector<128x1xf32>
    %cst_21 = arith.constant 0.000000e+00 : f32
    %53 = vector.broadcast %cst_21 : f32 to vector<128x1xf32>
    %54 = arith.maximumf %52, %53 : vector<128x1xf32>
    %cst_22 = arith.constant 1.000000e+00 : f32
    %55 = vector.broadcast %cst_22 : f32 to vector<128x1xf32>
    %56 = arith.addf %55, %54 : vector<128x1xf32>
    %57 = math.log %56 : vector<128x1xf32>
    %58 = vector.shape_cast %57 : vector<128x1xf32> to vector<1x128x1xf32>
    %cst_23 = arith.constant dense<0.000000e+00> : vector<1xf32>
    %59 = vector.multi_reduction <add>, %58, %cst_23 [1, 2] : vector<1x128x1xf32> to vector<1xf32>
    %60 = vector.shape_cast %59 : vector<1xf32> to vector<1x1x1xf32>
    %61 = vector.extract %60[0, 0, 0] : f32 from vector<1x1x1xf32>
    %cst_24 = arith.constant -1.000000e+01 : f32
    %62 = arith.mulf %cst_24, %61 : f32
    %c0_25 = arith.constant 0 : index
    %63 = memref.load %arg6[%c0_25] : memref<1xf32, #tpu.memory_space<smem>>
    %64 = arith.addf %63, %43 : f32
    %65 = arith.addf %64, %62 : f32
    %c0_26 = arith.constant 0 : index
    %66 = memref.load %arg6[%c0_26] : memref<1xf32, #tpu.memory_space<smem>>
    memref.store %65, %arg6[%c0_26] : memref<1xf32, #tpu.memory_space<smem>>
    %c0_i32_27 = arith.constant 0 : i32
    %67 = arith.cmpi eq, %arg0, %c0_i32_27 : i32
    %68 = arith.extui %67 : i1 to i32
    %c0_i32_28 = arith.constant 0 : i32
    %69 = arith.cmpi ne, %68, %c0_i32_28 : i32
    scf.if %69 {
      %c0_29 = arith.constant 0 : index
      %c0_30 = arith.constant 0 : index
      %70 = vector.load %arg5[%c0_29, %c0_30] : memref<128x1xf32, #tpu.memory_space<vmem>>, vector<128x1xf32>
      %cst_31 = arith.constant 1.000000e+00 : f32
      %71 = vector.broadcast %cst_31 : f32 to vector<128x1xf32>
      %72 = arith.addf %71, %70 : vector<128x1xf32>
      %73 = math.log %72 : vector<128x1xf32>
      %74 = vector.shape_cast %73 : vector<128x1xf32> to vector<1x128x1xf32>
      %cst_32 = arith.constant dense<0.000000e+00> : vector<1xf32>
      %75 = vector.multi_reduction <add>, %74, %cst_32 [1, 2] : vector<1x128x1xf32> to vector<1xf32>
      %76 = vector.shape_cast %75 : vector<1xf32> to vector<1x1x1xf32>
      %77 = vector.extract %76[0, 0, 0] : f32 from vector<1x1x1xf32>
      %cst_33 = arith.constant 0.0666666701 : f32
      %78 = arith.mulf %77, %cst_33 : f32
      %c0_34 = arith.constant 0 : index
      %79 = memref.load %arg6[%c0_34] : memref<1xf32, #tpu.memory_space<smem>>
      %80 = arith.addf %79, %78 : f32
      %cst_35 = arith.constant 1.250000e-01 : f32
      %81 = arith.mulf %80, %cst_35 : f32
      %c0_36 = arith.constant 0 : index
      %c0_37 = arith.constant 0 : index
      %82 = memref.load %arg3[%c0_36, %c0_37] : memref<1x1xf32, #tpu.memory_space<smem>>
      memref.store %81, %arg3[%c0_36, %c0_37] : memref<1x1xf32, #tpu.memory_space<smem>>
    } else {
    }
    return
  }
  func.func @transform_0(%arg0: i32) -> (i32, i32) {
    %c0_i32 = arith.constant 0 : i32
    %c0_i32_0 = arith.constant 0 : i32
    %c0_i32_1 = arith.constant 0 : i32
    return %c0_i32, %c0_i32_0 : i32, i32
  }
  func.func @transform_1(%arg0: i32) -> (i32, i32) {
    %c0_i32 = arith.constant 0 : i32
    %c0_i32_0 = arith.constant 0 : i32
    return %arg0, %c0_i32 : i32, i32
  }
  func.func @transform_2(%arg0: i32) -> (i32, i32) {
    %c0_i32 = arith.constant 0 : i32
    %c0_i32_0 = arith.constant 0 : i32
    %c0_i32_1 = arith.constant 0 : i32
    return %c0_i32, %c0_i32_0 : i32, i32
  }
}

</mosaic_0001>

<bundles_post_ra>
// kernel: tpu_custom_call.1
= control target key start
LH: loop header
LB: loop body
LE: loop exit
PB: predicated region body
PF: predicated region fallthrough
CT: control target
= control target key end

     0   :  { %vm48_vm0 = vcmask 261120   ;;  %s2105_s0 = inlined_call_operand.vmem [shape: f32[128,32], index: 0, kind: input, shape index: {}]   ;;  %s2106_s1 = inlined_call_operand.vmem [shape: f32[128,32], index: 1, kind: input, shape index: {}]   ;;  %s2107_s2 = inlined_call_operand.hbm [shape: f32[1,1], index: 2, kind: output, shape index: {}]  }
   0x1   :  { %v1489_v0 = vld [vmem:[%s2106_s1 + $0x78] sm:$0xff]  ;;  %v1494_v1 = vld [vmem:[%s2106_s1 + $0x68] sm:$0xff]  ;;  %v1499_v2 = vld [vmem:[%s2106_s1 + $0x70] sm:$0xff] }
   0x2   :  { %v227_v3 = vmul.f32 %v1489_v0, %v1489_v0  ;;  %v225_v4 = vmul.f32 %v1494_v1, %v1494_v1  ;;  %v226_v5 = vmul.f32 %v1499_v2, %v1499_v2  ;;  %v1510_v6 = vld [vmem:[%s2106_s1 + $0x60] sm:$0xff]  ;;  %v1517_v8 = vld [vmem:[%s2106_s1 + $0x58] sm:$0xff]  ;;  %v1522_v9 = vld [vmem:[%s2106_s1 + $0x50] sm:$0xff] }
   0x3   :  { %v224_v7 = vmul.f32 %v1510_v6, %v1510_v6  ;;  %v223_v14 = vmul.f32 %v1517_v8, %v1517_v8  ;;  %v222_v15 = vmul.f32 %v1522_v9, %v1522_v9  ;;  %v1535_v16 = vld [vmem:[%s2106_s1 + $0x48] sm:$0xff]  ;;  %v1540_v17 = vld [vmem:[%s2106_s1 + $0x40] sm:$0xff]  ;;  %v1551_v22 = vld [vmem:[%s2106_s1 + $0x38] sm:$0xff] }
   0x4   :  { %v274_v10 = vsel %vm48_vm0, %v227_v3, 0.0  ;;  %v268_v11 = vsel %vm48_vm0, %v225_v4, 0.0  ;;  %v271_v12 = vsel %vm48_vm0, %v226_v5, 0.0  ;;  %v221_v20 = vmul.f32 %v1535_v16, %v1535_v16  ;;  %v1556_v23 = vld [vmem:[%s2106_s1 + $0x30] sm:$0xff] }
   0x5   :  { %275 = vadd.xlane.f32.xlu0 %v274_v10  ;;  %269 = vadd.xlane.f32.xlu1 %v268_v11  ;;  %v265_v13 = vsel %vm48_vm0, %v224_v7, 0.0  ;;  %v262_v18 = vsel %vm48_vm0, %v223_v14, 0.0  ;;  %v259_v19 = vsel %vm48_vm0, %v222_v15, 0.0  ;;  %v220_v21 = vmul.f32 %v1540_v17, %v1540_v17 }
   0x9   :  { %272 = vadd.xlane.f32.xlu0 %v271_v12  ;;  %266 = vadd.xlane.f32.xlu1 %v265_v13 }
   0xa   :  { %7 = vsyncpa [#allocation6], 0  ;;  %v256_v24 = vsel %vm48_vm0, %v221_v20, 0.0  ;;  %v253_v25 = vsel %vm48_vm0, %v220_v21, 0.0  ;;  %v219_v26 = vmul.f32 %v1551_v22, %v1551_v22  ;;  %v218_v27 = vmul.f32 %v1556_v23, %v1556_v23  ;;  %v1567_v28 = vld [vmem:[%s2106_s1 + $0x28] sm:$0xff]  ;;  %v1572_v29 = vld [vmem:[%s2106_s1 + $0x20] sm:$0xff] }
   0xb   :  { %v217_v32 = vmul.f32 %v1567_v28, %v1567_v28  ;;  %v216_v33 = vmul.f32 %v1572_v29, %v1572_v29  ;;  %v1583_v34 = vld [vmem:[%s2106_s1 + $0x18] sm:$0xff]  ;;  %v1588_v35 = vld [vmem:[%s2106_s1 + $0x10] sm:$0xff]  ;;  %v1599_v40 = vld [vmem:[%s2105_s0 + $0x8] sm:$0xff]  ;;  %vm177_vm1 = vcmask 7168   ;;  %vm822_vm5 = vcmask 1040384   ;;  %s1470_s23 = smov [#allocation5]  }
   0xc   :  { %v250_v30 = vsel %vm48_vm0, %v219_v26, 0.0  ;;  %v247_v31 = vsel %vm48_vm0, %v218_v27, 0.0  ;;  %v215_v38 = vmul.f32 %v1583_v34, %v1583_v34  ;;  %v214_v39 = vmul.f32 %v1588_v35, %v1588_v35  ;;  %v1604_v41 = vld [vmem:[%s2105_s0] sm:$0xff]  ;;  %v1620_v47 = vld [vmem:[%s2106_s1 + $0x8] sm:$0xff]  ;;  %v1631_v52 = vld [vmem:[%s2105_s0 + $0x18] sm:$0xff] }
   0xd   :  { %263 = vadd.xlane.f32.xlu0 %v262_v18  ;;  %260 = vadd.xlane.f32.xlu1 %v259_v19  ;;  %v244_v36 = vsel %vm48_vm0, %v217_v32, 0.0  ;;  %v241_v37 = vsel %vm48_vm0, %v216_v33, 0.0  ;;  %v33_v44 = vmul.f32 %v1599_v40, %v1599_v40  ;;  %v32_v45 = vmul.f32 %v1604_v41, %v1604_v41  ;;  %v1615_v46 = vld [vmem:[%s2106_s1] sm:$0xff]  ;;  %v1636_v53 = vld [vmem:[%s2105_s0 + $0x10] sm:$0xff]  ;;  %v1647_v58 = vld [vmem:[%s2105_s0 + $0x28] sm:$0xff] }
   0xe   :  { %v238_v42 = vsel %vm48_vm0, %v215_v38, 0.0  ;;  %v235_v43 = vsel %vm48_vm0, %v214_v39, 0.0  ;;  %v212_v50 = vmul.f32 %v1615_v46, %v1615_v46  ;;  %v213_v51 = vmul.f32 %v1620_v47, %v1620_v47  ;;  %v1652_v59 = vld [vmem:[%s2105_s0 + $0x20] sm:$0xff]  ;;  %v1663_v3 = vld [vmem:[%s2105_s0 + $0x38] sm:$0xff]  ;;  %v1668_v4 = vld [vmem:[%s2105_s0 + $0x30] sm:$0xff] }
   0xf   :  { %v52_v48 = vsel %vm48_vm0, %v33_v44, 0.0  ;;  %v49_v49 = vsel %vm48_vm0, %v32_v45, 0.0  ;;  %v35_v56 = vmul.f32 %v1631_v52, %v1631_v52  ;;  %v34_v57 = vmul.f32 %v1636_v53, %v1636_v53  ;;  %v1679_v12 = vld [vmem:[%s2105_s0 + $0x48] sm:$0xff]  ;;  %v1684_v13 = vld [vmem:[%s2105_s0 + $0x40] sm:$0xff]  ;;  %v1695_v20 = vld [vmem:[%s2105_s0 + $0x58] sm:$0xff] }
  0x10   :  { %v229_v54 = vsel %vm48_vm0, %v212_v50, 0.0  ;;  %v232_v55 = vsel %vm48_vm0, %v213_v51, 0.0  ;;  %v37_v62 = vmul.f32 %v1647_v58, %v1647_v58  ;;  %v36_v63 = vmul.f32 %v1652_v59, %v1652_v59  ;;  %v1700_v21 = vld [vmem:[%s2105_s0 + $0x50] sm:$0xff]  ;;  %v1727_v38 = vld [vmem:[%s2105_s0 + $0x78] sm:$0xff] }
  0x11   :  { %257 = vadd.xlane.f32.xlu0 %v256_v24  ;;  %254 = vadd.xlane.f32.xlu1 %v253_v25  ;;  %v58_v60 = vsel %vm48_vm0, %v35_v56, 0.0  ;;  %v55_v61 = vsel %vm48_vm0, %v34_v57, 0.0  ;;  %v39_v10 = vmul.f32 %v1663_v3, %v1663_v3  ;;  %v38_v11 = vmul.f32 %v1668_v4, %v1668_v4  ;;  %v1732_v39 = vld [vmem:[%s2105_s0 + $0x70] sm:$0xff] }
  0x12   :  { %v64_v5 = vsel %vm48_vm0, %v37_v62, 0.0  ;;  %v61_v7 = vsel %vm48_vm0, %v36_v63, 0.0  ;;  %v41_v18 = vmul.f32 %v1679_v12, %v1679_v12  ;;  %v40_v19 = vmul.f32 %v1684_v13, %v1684_v13 }
  0x13   :  { %v70_v14 = vsel %vm48_vm0, %v39_v10, 0.0  ;;  %v67_v15 = vsel %vm48_vm0, %v38_v11, 0.0  ;;  %v43_v26 = vmul.f32 %v1695_v20, %v1695_v20  ;;  %v42_v27 = vmul.f32 %v1700_v21, %v1700_v21 }
  0x14   :  { %v76_v24 = vsel %vm48_vm0, %v41_v18, 0.0  ;;  %v73_v25 = vsel %vm48_vm0, %v40_v19, 0.0  ;;  %v47_v44 = vmul.f32 %v1727_v38, %v1727_v38  ;;  %v46_v45 = vmul.f32 %v1732_v39, %v1732_v39 }
  0x15   :  { %251 = vadd.xlane.f32.xlu0 %v250_v30  ;;  %248 = vadd.xlane.f32.xlu1 %v247_v31  ;;  %v1711_v30 = vld [vmem:[%s2105_s0 + $0x68] sm:$0xff]  ;;  %v1716_v31 = vld [vmem:[%s2105_s0 + $0x60] sm:$0xff]  ;;  %v82_v32 = vsel %vm48_vm0, %v43_v26, 0.0  ;;  %v79_v33 = vsel %vm48_vm0, %v42_v27, 0.0  ;;  %v1469_v50 = vmov 0.0  }
  0x16   :  { %180 = vst.msk [vmem:[#allocation3 + $0x10] sm:$0xff] %vm177_vm1, %v1469_v50  ;;  %178 = vst.msk [vmem:[#allocation3] sm:$0xff] %vm177_vm1, %v1469_v50 }
  0x17   :  { %179 = vst.msk [vmem:[#allocation3 + $0x8] sm:$0xff] %vm177_vm1, %v1469_v50  ;;  %181 = vst.msk [vmem:[#allocation3 + $0x18] sm:$0xff] %vm177_vm1, %v1469_v50 }
  0x18   :  { %182 = vst.msk [vmem:[#allocation3 + $0x20] sm:$0xff] %vm177_vm1, %v1469_v50  ;;  %183 = vst.msk [vmem:[#allocation3 + $0x28] sm:$0xff] %vm177_vm1, %v1469_v50 }
  0x19   :  { %245 = vadd.xlane.f32.xlu0 %v244_v36  ;;  %242 = vadd.xlane.f32.xlu1 %v241_v37  ;;  %v45_v36 = vmul.f32 %v1711_v30, %v1711_v30  ;;  %v44_v37 = vmul.f32 %v1716_v31, %v1716_v31  ;;  %184 = vst.msk [vmem:[#allocation3 + $0x30] sm:$0xff] %vm177_vm1, %v1469_v50  ;;  %185 = vst.msk [vmem:[#allocation3 + $0x38] sm:$0xff] %vm177_vm1, %v1469_v50 }
  0x1a   :  { %186 = vst.msk [vmem:[#allocation3 + $0x40] sm:$0xff] %vm177_vm1, %v1469_v50  ;;  %187 = vst.msk [vmem:[#allocation3 + $0x48] sm:$0xff] %vm177_vm1, %v1469_v50 }
  0x1b   :  { %188 = vst.msk [vmem:[#allocation3 + $0x50] sm:$0xff] %vm177_vm1, %v1469_v50  ;;  %189 = vst.msk [vmem:[#allocation3 + $0x58] sm:$0xff] %vm177_vm1, %v1469_v50 }
  0x1c   :  { %190 = vst.msk [vmem:[#allocation3 + $0x60] sm:$0xff] %vm177_vm1, %v1469_v50  ;;  %191 = vst.msk [vmem:[#allocation3 + $0x68] sm:$0xff] %vm177_vm1, %v1469_v50 }
  0x1d   :  { %239 = vadd.xlane.f32.xlu0 %v238_v42  ;;  %236 = vadd.xlane.f32.xlu1 %v235_v43  ;;  %v88_v42 = vsel %vm48_vm0, %v45_v36, 0.0  ;;  %v85_v43 = vsel %vm48_vm0, %v44_v37, 0.0  ;;  %192 = vst.msk [vmem:[#allocation3 + $0x70] sm:$0xff] %vm177_vm1, %v1469_v50  ;;  %193 = vst.msk [vmem:[#allocation3 + $0x78] sm:$0xff] %vm177_vm1, %v1469_v50 }
  0x21   :  { %53 = vadd.xlane.f32.xlu1 %v52_v48  ;;  %50 = vadd.xlane.f32.xlu0 %v49_v49  ;;  %v94_v48 = vsel %vm48_vm0, %v47_v44, 0.0  ;;  %v91_v49 = vsel %vm48_vm0, %v46_v45, 0.0 }
  0x25   :  { %230 = vadd.xlane.f32.xlu1 %v229_v54  ;;  %233 = vadd.xlane.f32.xlu0 %v232_v55 }
  0x29   :  { %59 = vadd.xlane.f32.xlu1 %v58_v60  ;;  %56 = vadd.xlane.f32.xlu0 %v55_v61 }
  0x2d   :  { %65 = vadd.xlane.f32.xlu1 %v64_v5  ;;  %62 = vadd.xlane.f32.xlu0 %v61_v7 }
  0x31   :  { %71 = vadd.xlane.f32.xlu1 %v70_v14  ;;  %68 = vadd.xlane.f32.xlu0 %v67_v15 }
  0x35   :  { %77 = vadd.xlane.f32.xlu1 %v76_v24  ;;  %74 = vadd.xlane.f32.xlu0 %v73_v25 }
  0x39   :  { %83 = vadd.xlane.f32.xlu1 %v82_v32  ;;  %80 = vadd.xlane.f32.xlu0 %v79_v33 }
  0x3d   :  { %89 = vadd.xlane.f32.xlu1 %v88_v42  ;;  %86 = vadd.xlane.f32.xlu0 %v85_v43 }
  0x41   :  { %95 = vadd.xlane.f32.xlu1 %v94_v48  ;;  %92 = vadd.xlane.f32.xlu0 %v91_v49 }
  0x45   :  { %737 = vadd.xlane.f32.xlu0 %v1469_v50  ;;  %735 = vadd.xlane.f32.xlu1 %v1469_v50 }
  0x49   :  { %741 = vadd.xlane.f32.xlu0 %v1469_v50  ;;  %739 = vadd.xlane.f32.xlu1 %v1469_v50 }
  0x4d   :  { %743 = vadd.xlane.f32.xlu0 %v1469_v50 }
  0x51   :  { %745 = vadd.xlane.f32.xlu0 %v1469_v50 }
  0x55   :  { %747 = vadd.xlane.f32.xlu0 %v1469_v50 }
  0x59   :  { %749 = vadd.xlane.f32.xlu0 %v1469_v50 }
  0x8e   :  { %v276_v51 = vpop.xlane.xlu0 %275  ;;  %v270_v54 = vpop.xlane.xlu1 %269 }
  0x8f   :  { %v292_v55 = vmax.f32 %v276_v51, 1e-24  ;;  %v290_v56 = vmax.f32 %v270_v54, 1e-24 }
  0x91   :  { %1327 = vrsqrt.f32 %v292_v55 }
  0x92   :  { %v273_v57 = vpop.xlane.xlu0 %272  ;;  %v267_v60 = vpop.xlane.xlu1 %266  ;;  %1329 = vrsqrt.f32 %v290_v56 }
  0x93   :  { %v291_v61 = vmax.f32 %v273_v57, 1e-24  ;;  %v289_v62 = vmax.f32 %v267_v60, 1e-24 }
  0x95   :  { %1331 = vrsqrt.f32 %v291_v61 }
  0x96   :  { %v264_v63 = vpop.xlane.xlu0 %263  ;;  %v261_v5 = vpop.xlane.xlu1 %260  ;;  %1333 = vrsqrt.f32 %v289_v62 }
  0x97   :  { %v288_v7 = vmax.f32 %v264_v63, 1e-24  ;;  %v287_v14 = vmax.f32 %v261_v5, 1e-24 }
  0x99   :  { %1335 = vrsqrt.f32 %v288_v7 }
  0x9a   :  { %v258_v10 = vpop.xlane.xlu0 %257  ;;  %v255_v11 = vpop.xlane.xlu1 %254  ;;  %1337 = vrsqrt.f32 %v287_v14 }
  0x9b   :  { %v286_v24 = vmax.f32 %v258_v10, 1e-24  ;;  %v285_v36 = vmax.f32 %v255_v11, 1e-24 }
  0x9d   :  { %1339 = vrsqrt.f32 %v286_v24 }
  0x9e   :  { %v1328_v15 = vpop.eup %1327  ;;  %v252_v18 = vpop.xlane.xlu0 %251  ;;  %1341 = vrsqrt.f32 %v285_v36 }
  0x9f   :  { %v249_v19 = vpop.xlane.xlu1 %248  ;;  %v1783_v25 = vmul.f32 %v1328_v15, %v1489_v0  ;;  %v1330_v26 = vpop.eup %1329 }
  0xa0   :  { %v1797_v37 = vmul.f32 %v1330_v26, %v1494_v1  ;;  %v283_v48 = vmax.f32 %v249_v19, 1e-24 }
  0xa1   :  { %1231 = vmatprep.subr.msk.mxu0 %vm48_vm0, %v1783_v25  ;;  %1287 = vmatprep.subr.msk.mxu1 %vm48_vm0, %v1783_v25 }
  0xa2   :  { %v1332_v27 = vpop.eup %1331  ;;  %1232 = vmatpush3.xpose.msk.msra.mxu0 %vm48_vm0, %v1783_v25  ;;  %1303 = vmatpush3.xpose.msk.msra.mxu1 %vm48_vm0, %v1783_v25  ;;  %v246_v32 = vpop.xlane.xlu0 %245 }
  0xa3   :  { %v243_v33 = vpop.xlane.xlu1 %242  ;;  %v1794_v0 = vmul.f32 %v1332_v27, %v1499_v2  ;;  %v1334_v42 = vpop.eup %1333  ;;  %v284_v2 = vmax.f32 %v252_v18, 1e-24  ;;  %v282_v57 = vmax.f32 %v246_v32, 1e-24 }
  0xa4   :  { %v1814_v1 = vmul.f32 %v1334_v42, %v1510_v6  ;;  %v281_v60 = vmax.f32 %v243_v33, 1e-24 }
  0xa5   :  { %1233 = vmatprep.subr.msk.mxu0 %vm48_vm0, %v1794_v0  ;;  %1288 = vmatprep.subr.msk.mxu1 %vm48_vm0, %v1794_v0  ;;  %1343 = vrsqrt.f32 %v284_v2 }
  0xa6   :  { %1234 = vmatpush3.xpose.msk.msra.mxu0 %vm48_vm0, %v1794_v0  ;;  %1304 = vmatpush3.xpose.msk.msra.mxu1 %vm48_vm0, %v1794_v0  ;;  %v240_v43 = vpop.xlane.xlu0 %239  ;;  %v1336_v45 = vpop.eup %1335 }
  0xa7   :  { %v1807_v44 = vpop.xlane.xlu1 %236  ;;  %1235 = vmatprep.subr.msk.mxu0 %vm48_vm0, %v1797_v37  ;;  %1289 = vmatprep.subr.msk.mxu1 %vm48_vm0, %v1797_v37  ;;  %v1825_v6 = vmul.f32 %v1336_v45, %v1517_v8  ;;  %v1338_v56 = vpop.eup %1337  ;;  %v280_v19 = vmax.f32 %v240_v43, 1e-24 }
  0xa8   :  { %v1836_v8 = vmul.f32 %v1338_v56, %v1522_v9  ;;  %v279_v36 = vmax.f32 %v1807_v44, 1e-24 }
  0xaa   :  { %1236 = vmatpush3.xpose.msk.msra.mxu0 %vm48_vm0, %v1797_v37  ;;  %1305 = vmatpush3.xpose.msk.msra.mxu1 %vm48_vm0, %v1797_v37  ;;  %v51_v51 = vpop.xlane.xlu0 %50  ;;  %v1340_v5 = vpop.eup %1339 }
  0xab   :  { %v54_v49 = vpop.xlane.xlu1 %53  ;;  %v97_v55 = vmax.f32 %v51_v51, 1e-24  ;;  %1237 = vmatprep.subr.msk.mxu0 %vm48_vm0, %v1814_v1  ;;  %1290 = vmatprep.subr.msk.mxu1 %vm48_vm0, %v1814_v1  ;;  %v1847_v9 = vmul.f32 %v1340_v5, %v1535_v16  ;;  %v1342_v18 = vpop.eup %1341 }
  0xac   :  { %v98_v54 = vmax.f32 %v54_v49, 1e-24  ;;  %v1858_v16 = vmul.f32 %v1342_v18, %v1540_v17 }
  0xae   :  { %1345 = vrsqrt.f32 %v98_v54  ;;  %1238 = vmatpush3.xpose.msk.msra.mxu0 %vm48_vm0, %v1814_v1  ;;  %1306 = vmatpush3.xpose.msk.msra.mxu1 %vm48_vm0, %v1814_v1  ;;  %v234_v62 = vpop.xlane.xlu0 %233 }
  0xaf   :  { %1347 = vrsqrt.f32 %v97_v55  ;;  %v231_v61 = vpop.xlane.xlu1 %230  ;;  %v278_v63 = vmax.f32 %v234_v62, 1e-24  ;;  %1239 = vmatprep.subr.msk.mxu0 %vm48_vm0, %v1825_v6  ;;  %1291 = vmatprep.subr.msk.mxu1 %vm48_vm0, %v1825_v6 }
  0xb0   :  { %1349 = vrsqrt.f32 %v283_v48  ;;  %v277_v7 = vmax.f32 %v231_v61, 1e-24 }
  0xb1   :  { %1351 = vrsqrt.f32 %v282_v57 }
  0xb2   :  { %1353 = vrsqrt.f32 %v281_v60  ;;  %1240 = vmatpush3.xpose.msk.msra.mxu0 %vm48_vm0, %v1825_v6  ;;  %1307 = vmatpush3.xpose.msk.msra.mxu1 %vm48_vm0, %v1825_v6  ;;  %v57_v11 = vpop.xlane.xlu0 %56  ;;  %v1344_v33 = vpop.eup %1343 }
  0xb3   :  { %v60_v10 = vpop.xlane.xlu1 %59  ;;  %1355 = vrsqrt.f32 %v278_v63  ;;  %v99_v15 = vmax.f32 %v57_v11, 1e-24  ;;  %1241 = vmatprep.subr.msk.mxu0 %vm48_vm0, %v1836_v8  ;;  %1292 = vmatprep.subr.msk.mxu1 %vm48_vm0, %v1836_v8  ;;  %v1870_v44 = vmul.f32 %v1344_v33, %v1551_v22 }
  0xb4   :  { %v100_v14 = vmax.f32 %v60_v10, 1e-24  ;;  %1357 = vrsqrt.f32 %v277_v7 }
  0xb6   :  { %1359 = vrsqrt.f32 %v100_v14  ;;  %1242 = vmatpush3.xpose.msk.msra.mxu0 %vm48_vm0, %v1836_v8  ;;  %1308 = vmatpush3.xpose.msk.msra.mxu1 %vm48_vm0, %v1836_v8  ;;  %v63_v26 = vpop.xlane.xlu0 %62 }
  0xb7   :  { %1361 = vrsqrt.f32 %v99_v15  ;;  %v66_v24 = vpop.xlane.xlu1 %65  ;;  %v101_v32 = vmax.f32 %v63_v26, 1e-24  ;;  %1243 = vmatprep.subr.msk.mxu0 %vm48_vm0, %v1847_v9  ;;  %1293 = vmatprep.subr.msk.mxu1 %vm48_vm0, %v1847_v9 }
  0xb8   :  { %v102_v27 = vmax.f32 %v66_v24, 1e-24  ;;  %1363 = vrsqrt.f32 %v280_v19 }
  0xba   :  { %1365 = vrsqrt.f32 %v102_v27  ;;  %1244 = vmatpush3.xpose.msk.msra.mxu0 %vm48_vm0, %v1847_v9  ;;  %1309 = vmatpush3.xpose.msk.msra.mxu1 %vm48_vm0, %v1847_v9  ;;  %v69_v2 = vpop.xlane.xlu0 %68 }
  0xbb   :  { %v1346_v42 = vpop.eup %1345  ;;  %1367 = vrsqrt.f32 %v101_v32  ;;  %v72_v43 = vpop.xlane.xlu1 %71  ;;  %v103_v17 = vmax.f32 %v69_v2, 1e-24  ;;  %1245 = vmatprep.subr.msk.mxu0 %vm48_vm0, %v1858_v16  ;;  %1294 = vmatprep.subr.msk.mxu1 %vm48_vm0, %v1858_v16 }
  0xbc   :  { %v1348_v45 = vpop.eup %1347  ;;  %v130_v48 = vmul.f32 15.0, %v1346_v42  ;;  %v104_v49 = vmax.f32 %v72_v43, 1e-24  ;;  %1369 = vrsqrt.f32 %v279_v36 }
  0xbd   :  { %v1350_v51 = vpop.eup %1349  ;;  %v129_v54 = vmul.f32 15.0, %v1348_v45 }
  0xbe   :  { %v146_v55 = vmul.f32 %v130_v48, %v1599_v40  ;;  %1371 = vrsqrt.f32 %v104_v49  ;;  %v1352_v56 = vpop.eup %1351  ;;  %1246 = vmatpush3.xpose.msk.msra.mxu0 %vm48_vm0, %v1858_v16  ;;  %1310 = vmatpush3.xpose.msk.msra.mxu1 %vm48_vm0, %v1858_v16  ;;  %v75_v61 = vpop.xlane.xlu0 %74  ;;  %v1884_v40 = vmul.f32 %v1350_v51, %v1556_v23 }
  0xbf   :  { %v145_v57 = vmul.f32 %v129_v54, %v1604_v41  ;;  %1373 = vrsqrt.f32 %v103_v17  ;;  %v78_v60 = vpop.xlane.xlu1 %77  ;;  %v1354_v22 = vpop.eup %1353  ;;  %v105_v63 = vmax.f32 %v75_v61, 1e-24  ;;  %1247 = vmatprep.subr.msk.mxu0 %vm48_vm0, %v1870_v44  ;;  %1295 = vmatprep.subr.msk.mxu1 %vm48_vm0, %v1870_v44  ;;  %v1892_v14 = vmul.f32 %v1352_v56, %v1567_v28 }
  0xc0   :  { %162 = vst.msk [vmem:[#allocation2 + $0x8] sm:$0xff] %vm48_vm0, %v146_v55  ;;  %v106_v62 = vmax.f32 %v78_v60, 1e-24  ;;  %v1356_v41 = vpop.eup %1355  ;;  %v1911_v43 = vmul.f32 %v1354_v22, %v1572_v29 }
  0xc1   :  { %161 = vst.msk [vmem:[#allocation2] sm:$0xff] %vm48_vm0, %v145_v57  ;;  %v1358_v5 = vpop.eup %1357  ;;  %v1899_v24 = vmul.f32 %v1356_v41, %v1620_v47 }
  0xc2   :  { %1375 = vrsqrt.f32 %v106_v62  ;;  %1248 = vmatpush3.xpose.msk.msra.mxu0 %vm48_vm0, %v1870_v44  ;;  %1311 = vmatpush3.xpose.msk.msra.mxu1 %vm48_vm0, %v1870_v44  ;;  %v81_v11 = vpop.xlane.xlu0 %80  ;;  %v1902_v27 = vmul.f32 %v1358_v5, %v1615_v46 }
  0xc3   :  { %v1360_v7 = vpop.eup %1359  ;;  %1377 = vrsqrt.f32 %v105_v63  ;;  %v84_v10 = vpop.xlane.xlu1 %83  ;;  %v107_v19 = vmax.f32 %v81_v11, 1e-24  ;;  %1249 = vmatprep.subr.msk.mxu0 %vm48_vm0, %v1884_v40  ;;  %1296 = vmatprep.subr.msk.mxu1 %vm48_vm0, %v1884_v40  ;;  %v718_v11 = vld [vmem:[#allocation3 + $0x8] sm:$0xff] }
  0xc4   :  { %v1362_v23 = vpop.eup %1361  ;;  %v132_v15 = vmul.f32 15.0, %v1360_v7  ;;  %v108_v18 = vmax.f32 %v84_v10, 1e-24  ;;  %v719_v10 = vld [vmem:[#allocation3 + $0x10] sm:$0xff] }
  0xc5   :  { %v131_v26 = vmul.f32 15.0, %v1362_v23  ;;  %v1364_v32 = vpop.eup %1363 }
  0xc6   :  { %v148_v28 = vmul.f32 %v132_v15, %v1631_v52  ;;  %1379 = vrsqrt.f32 %v108_v18  ;;  %1250 = vmatpush3.xpose.msk.msra.mxu0 %vm48_vm0, %v1884_v40  ;;  %1312 = vmatpush3.xpose.msk.msra.mxu1 %vm48_vm0, %v1884_v40  ;;  %v87_v42 = vpop.xlane.xlu0 %86 }
  0xc7   :  { %v1366_v33 = vpop.eup %1365  ;;  %v147_v36 = vmul.f32 %v131_v26, %v1636_v53  ;;  %1381 = vrsqrt.f32 %v107_v19  ;;  %v90_v47 = vpop.xlane.xlu1 %89  ;;  %v1913_v46 = vld [vmem:[#allocation2 + $0x8] sm:$0xff]  ;;  %v109_v53 = vmax.f32 %v87_v42, 1e-24  ;;  %1251 = vmatprep.subr.msk.mxu0 %vm48_vm0, %v1892_v14  ;;  %1297 = vmatprep.subr.msk.mxu1 %vm48_vm0, %v1892_v14  ;;  %v720_v42 = vld [vmem:[#allocation3 + $0x18] sm:$0xff] }
  0xc8   :  { %v1368_v2 = vpop.eup %1367  ;;  %164 = vst.msk [vmem:[#allocation2 + $0x18] sm:$0xff] %vm48_vm0, %v148_v28  ;;  %v134_v52 = vmul.f32 15.0, %v1366_v33  ;;  %v110_v45 = vmax.f32 %v90_v47, 1e-24  ;;  %v852_v48 = vmul.f32 %v1913_v46, %v1899_v24  ;;  %v835_v49 = vld [vmem:[#allocation2] sm:$0xff] }
  0xc9   :  { %163 = vst.msk [vmem:[#allocation2 + $0x10] sm:$0xff] %vm48_vm0, %v147_v36  ;;  %v133_v29 = vmul.f32 15.0, %v1368_v2  ;;  %v851_v17 = vmul.f32 %v835_v49, %v1902_v27  ;;  %1263 = vmatprep.mubr.msk.f32.mxu0 %vm48_vm0, %v835_v49  ;;  %v1370_v51 = vpop.eup %1369  ;;  %v721_v47 = vld [vmem:[#allocation3 + $0x20] sm:$0xff] }
  0xca   :  { %v150_v54 = vmul.f32 %v134_v52, %v1647_v58  ;;  %1383 = vrsqrt.f32 %v110_v45  ;;  %v870_v55 = vsel %vm48_vm0, %v852_v48, 0.0  ;;  %1252 = vmatpush3.xpose.msk.msra.mxu0 %vm48_vm0, %v1892_v14  ;;  %1313 = vmatpush3.xpose.msk.msra.mxu1 %vm48_vm0, %v1892_v14  ;;  %v93_v61 = vpop.xlane.xlu0 %92  ;;  %v311_v7 = vmul.f32 %v1370_v51, %v1588_v35 }
  0xcb   :  { %v1372_v56 = vpop.eup %1371  ;;  %v149_v57 = vmul.f32 %v133_v29, %v1652_v59  ;;  %1385 = vrsqrt.f32 %v109_v53  ;;  %v96_v60 = vpop.xlane.xlu1 %95  ;;  %v867_v22 = vsel %vm48_vm0, %v851_v17, 0.0  ;;  %v111_v41 = vmax.f32 %v93_v61, 1e-24  ;;  %1253 = vmatprep.subr.msk.mxu0 %vm48_vm0, %v1911_v43  ;;  %1298 = vmatprep.subr.msk.mxu1 %vm48_vm0, %v1911_v43 }
  0xcc   :  { %v1374_v62 = vpop.eup %1373  ;;  %166 = vst.msk [vmem:[#allocation2 + $0x28] sm:$0xff] %vm48_vm0, %v150_v54  ;;  %v136_v58 = vmul.f32 15.0, %v1372_v56  ;;  %v112_v63 = vmax.f32 %v96_v60, 1e-24  ;;  %v312_v59 = vmul.f32 %v1364_v32, %v1583_v34  ;;  %871 = vadd.xlane.f32.xlu1 %v870_v55  ;;  %868 = vadd.xlane.f32.xlu0 %v867_v22  ;;  %v722_v56 = vld [vmem:[#allocation3 + $0x28] sm:$0xff] }
  0xcd   :  { %165 = vst.msk [vmem:[#allocation2 + $0x20] sm:$0xff] %vm48_vm0, %v149_v57  ;;  %v135_v5 = vmul.f32 15.0, %v1374_v62 }
  0xce   :  { %v152_v23 = vmul.f32 %v136_v58, %v1663_v3  ;;  %1387 = vrsqrt.f32 %v112_v63  ;;  %1254 = vmatpush3.xpose.msk.msra.mxu0 %vm48_vm0, %v1911_v43  ;;  %1314 = vmatpush3.xpose.msk.msra.mxu1 %vm48_vm0, %v1911_v43  ;;  %v738_v34 = vpop.xlane.xlu0 %737 }
  0xcf   :  { %v1376_v15 = vpop.eup %1375  ;;  %v151_v18 = vmul.f32 %v135_v5, %v1668_v4  ;;  %1389 = vrsqrt.f32 %v111_v41  ;;  %v736_v19 = vpop.xlane.xlu1 %735  ;;  %1255 = vmatprep.subr.msk.mxu0 %vm48_vm0, %v312_v59  ;;  %1299 = vmatprep.subr.msk.mxu1 %vm48_vm0, %v312_v59  ;;  %v1952_v4 = vld [vmem:[#allocation2 + $0x18] sm:$0xff]  ;;  %v767_v32 = vadd.f32 %v738_v34, %v719_v10  ;;  %v723_v5 = vld [vmem:[#allocation3 + $0x30] sm:$0xff] }
  0xd0   :  { %v1378_v26 = vpop.eup %1377  ;;  %168 = vst.msk [vmem:[#allocation2 + $0x38] sm:$0xff] %vm48_vm0, %v152_v23  ;;  %v138_v35 = vmul.f32 15.0, %v1376_v15  ;;  %v1950_v3 = vld [vmem:[#allocation2 + $0x10] sm:$0xff]  ;;  %v766_v28 = vadd.f32 %v736_v19, %v718_v11  ;;  %v854_v48 = vmul.f32 %v1952_v4, %v312_v59 }
  0xd1   :  { %167 = vst.msk [vmem:[#allocation2 + $0x30] sm:$0xff] %vm48_vm0, %v151_v18  ;;  %v137_v33 = vmul.f32 15.0, %v1378_v26  ;;  %v853_v36 = vmul.f32 %v1950_v3, %v311_v7 }
  0xd2   :  { %v154_v2 = vmul.f32 %v138_v35, %v1679_v12  ;;  %784 = vst.msk [vmem:[#allocation3 + $0x10] sm:$0xff] %vm177_vm1, %v767_v32  ;;  %783 = vst.msk [vmem:[#allocation3 + $0x8] sm:$0xff] %vm177_vm1, %v766_v28  ;;  %1256 = vmatpush3.xpose.msk.msra.mxu0 %vm48_vm0, %v312_v59  ;;  %1315 = vmatpush3.xpose.msk.msra.mxu1 %vm48_vm0, %v312_v59  ;;  %v742_v49 = vpop.xlane.xlu0 %741  ;;  %v876_v22 = vsel %vm48_vm0, %v854_v48, 0.0 }
  0xd3   :  { %v1380_v52 = vpop.eup %1379  ;;  %v153_v45 = vmul.f32 %v137_v33, %v1684_v13  ;;  %v873_v53 = vsel %vm48_vm0, %v853_v36, 0.0  ;;  %v740_v29 = vpop.xlane.xlu1 %739  ;;  %1257 = vmatprep.subr.msk.mxu0 %vm48_vm0, %v311_v7  ;;  %v769_v13 = vadd.f32 %v742_v49, %v721_v47  ;;  %1300 = vmatprep.subr.msk.mxu1 %vm48_vm0, %v311_v7  ;;  %v840_v41 = vld [vmem:[#allocation2 + $0x28] sm:$0xff] }
  0xd4   :  { %v1382_v17 = vpop.eup %1381  ;;  %170 = vst.msk [vmem:[#allocation2 + $0x48] sm:$0xff] %vm48_vm0, %v154_v2  ;;  %v140_v12 = vmul.f32 15.0, %v1380_v52  ;;  %874 = vadd.xlane.f32.xlu1 %v873_v53  ;;  %v1966_v51 = vld [vmem:[#allocation2 + $0x20] sm:$0xff]  ;;  %v768_v54 = vadd.f32 %v740_v29, %v720_v42  ;;  %v856_v23 = vmul.f32 %v840_v41, %v1892_v14 }
  0xd5   :  { %169 = vst.msk [vmem:[#allocation2 + $0x40] sm:$0xff] %vm48_vm0, %v153_v45  ;;  %v139_v55 = vmul.f32 15.0, %v1382_v17  ;;  %v855_v62 = vmul.f32 %v1966_v51, %v1911_v43  ;;  %v725_v53 = vld [vmem:[#allocation3 + $0x40] sm:$0xff] }
  0xd6   :  { %v156_v57 = vmul.f32 %v140_v12, %v1695_v20  ;;  %786 = vst.msk [vmem:[#allocation3 + $0x20] sm:$0xff] %vm177_vm1, %v769_v13  ;;  %785 = vst.msk [vmem:[#allocation3 + $0x18] sm:$0xff] %vm177_vm1, %v768_v54  ;;  %1258 = vmatpush3.xpose.msk.msra.mxu0 %vm48_vm0, %v311_v7  ;;  %1316 = vmatpush3.xpose.msk.msra.mxu1 %vm48_vm0, %v311_v7  ;;  %v744_v58 = vpop.xlane.xlu0 %743  ;;  %v882_v32 = vsel %vm48_vm0, %v856_v23, 0.0 }
  0xd7   :  { %v1384_v60 = vpop.eup %1383  ;;  %v155_v61 = vmul.f32 %v139_v55, %v1700_v21  ;;  %1259 = vmatprep.subr.msk.mxu0 %vm48_vm0, %v1899_v24  ;;  %v770_v21 = vadd.f32 %v744_v58, %v722_v56  ;;  %1301 = vmatprep.subr.msk.mxu1 %vm48_vm0, %v1899_v24  ;;  %v879_v11 = vsel %vm48_vm0, %v855_v62, 0.0  ;;  %v842_v36 = vld [vmem:[#allocation2 + $0x38] sm:$0xff] }
  0xd8   :  { %v1386_v63 = vpop.eup %1385  ;;  %172 = vst.msk [vmem:[#allocation2 + $0x58] sm:$0xff] %vm48_vm0, %v156_v57  ;;  %v142_v20 = vmul.f32 15.0, %v1384_v60  ;;  %877 = vadd.xlane.f32.xlu1 %v876_v22 }
  0xd9   :  { %171 = vst.msk [vmem:[#allocation2 + $0x50] sm:$0xff] %vm48_vm0, %v155_v61  ;;  %v141_v59 = vmul.f32 15.0, %v1386_v63  ;;  %v582_v63 = vlaneseq }
  0xda   :  { %v158_v43 = vmul.f32 %v142_v20, %v1711_v30  ;;  %787 = vst.msk [vmem:[#allocation3 + $0x28] sm:$0xff] %vm177_vm1, %v770_v21  ;;  %1260 = vmatpush3.xpose.msk.msra.mxu0 %vm48_vm0, %v1899_v24  ;;  %1317 = vmatpush3.xpose.msk.msra.mxu1 %vm48_vm0, %v1899_v24  ;;  %v746_v15 = vpop.xlane.xlu0 %745  ;;  %v724_v24 = vld [vmem:[#allocation3 + $0x38] sm:$0xff] }
  0xdb   :  { %v1388_v7 = vpop.eup %1387  ;;  %v157_v10 = vmul.f32 %v141_v59, %v1716_v31  ;;  %1261 = vmatprep.subr.msk.mxu0 %vm48_vm0, %v1902_v27  ;;  %v841_v31 = vld [vmem:[#allocation2 + $0x30] sm:$0xff]  ;;  %v771_v19 = vadd.f32 %v746_v15, %v723_v5  ;;  %1302 = vmatprep.subr.msk.mxu1 %vm48_vm0, %v1902_v27  ;;  %v844_v47 = vld [vmem:[#allocation2 + $0x48] sm:$0xff]  ;;  %v583_v59 = vshrl.u32 %v582_v63, 7  ;;  %v600_v5 = vand.u32 127, %v582_v63 }
  0xdc   :  { %v1390_v18 = vpop.eup %1389  ;;  %174 = vst.msk [vmem:[#allocation2 + $0x68] sm:$0xff] %vm48_vm0, %v158_v43  ;;  %v144_v30 = vmul.f32 15.0, %v1388_v7  ;;  %880 = vadd.xlane.f32.xlu1 %v879_v11  ;;  %v843_v34 = vld [vmem:[#allocation2 + $0x40] sm:$0xff]  ;;  %v857_v28 = vmul.f32 %v841_v31, %v1884_v40  ;;  %v858_v40 = vmul.f32 %v842_v36, %v1870_v44  ;;  %v860_v45 = vmul.f32 %v844_v47, %v1847_v9  ;;  %v1046_v63 = vld [vmem:[#allocation3 + $0x10] sm:$0xff] }
  0xdd   :  { %173 = vst.msk [vmem:[#allocation2 + $0x60] sm:$0xff] %vm48_vm0, %v157_v10  ;;  %v143_v26 = vmul.f32 15.0, %v1390_v18  ;;  %1275 = vmatprep.mubr.msk.f32.mxu1 %vm48_vm0, %v843_v34  ;;  %v859_v52 = vmul.f32 %v843_v34, %v1858_v16  ;;  %vm604_vm2 = vcmp.ne.s32.totalorder %v583_v59, %v600_v5  ;;  %vm652_vm3 = vcmp.lt.s32.totalorder %v600_v5, 8 }
  0xde   :  { %v160_v14 = vmul.f32 %v144_v30, %v1727_v38  ;;  %788 = vst.msk [vmem:[#allocation3 + $0x30] sm:$0xff] %vm177_vm1, %v771_v19  ;;  %1262 = vmatpush3.xpose.msk.msra.mxu0 %vm48_vm0, %v1902_v27  ;;  %1318 = vmatpush3.xpose.msk.msra.mxu1 %vm48_vm0, %v1902_v27  ;;  %v748_v33 = vpop.xlane.xlu0 %747  ;;  %v885_v27 = vsel %vm48_vm0, %v857_v28, 0.0  ;;  %v894_v29 = vsel %vm48_vm0, %v860_v45, 0.0  ;;  %vm653_vm4 = vmand %vm604_vm2, %vm652_vm3 }
  0xdf   :  { %v159_v35 = vmul.f32 %v143_v26, %v1732_v39  ;;  %v772_v38 = vadd.f32 %v748_v33, %v724_v24  ;;  %v846_v42 = vld [vmem:[#allocation2 + $0x58] sm:$0xff] }
  0xe0   :  { %176 = vst.msk [vmem:[#allocation2 + $0x78] sm:$0xff] %vm48_vm0, %v160_v14  ;;  %883 = vadd.xlane.f32.xlu1 %v882_v32  ;;  %v845_v39 = vld [vmem:[#allocation2 + $0x50] sm:$0xff]  ;;  %v862_v12 = vmul.f32 %v846_v42, %v1825_v6 }
  0xe1   :  { %175 = vst.msk [vmem:[#allocation2 + $0x70] sm:$0xff] %vm48_vm0, %v159_v35  ;;  %1264 = vmatmul.mubr.msk.f32.vlgmr.msra.gmra.mxu0 %vm48_vm0, %v1913_v46  ;;  %1276 = vmatmul.mubr.msk.f32.vlgmr.msra.gmra.mxu1 %vm48_vm0, %v844_v47  ;;  %v888_v46 = vsel %vm48_vm0, %v858_v40, 0.0  ;;  %v861_v17 = vmul.f32 %v845_v39, %v1836_v8 }
  0xe2   :  { %789 = vst.msk [vmem:[#allocation3 + $0x38] sm:$0xff] %vm177_vm1, %v772_v38  ;;  %1266 = vmatprep.mubr.msk.f32.mxu0 %vm48_vm0, %v1950_v3  ;;  %1278 = vmatprep.mubr.msk.f32.mxu1 %vm48_vm0, %v845_v39  ;;  %v750_v48 = vpop.xlane.xlu0 %749 }
  0xe3   :  { %v848_v44 = vld [vmem:[#allocation2 + $0x68] sm:$0xff]  ;;  %v773_v49 = vadd.f32 %v750_v48, %v725_v53  ;;  %v897_v9 = vsel %vm48_vm0, %v861_v17, 0.0 }
  0xe4   :  { %886 = vadd.xlane.f32.xlu1 %v885_v27  ;;  %v847_v2 = vld [vmem:[#allocation2 + $0x60] sm:$0xff]  ;;  %v864_v55 = vmul.f32 %v848_v44, %v1797_v37 }
  0xe5   :  { %1267 = vmatmul.mubr.msk.f32.gmra.mxu0 %vm48_vm0, %v1952_v4  ;;  %1279 = vmatmul.mubr.msk.f32.gmra.mxu1 %vm48_vm0, %v846_v42  ;;  %v891_v4 = vsel %vm48_vm0, %v859_v52, 0.0  ;;  %790 = vst.msk [vmem:[#allocation3 + $0x40] sm:$0xff] %vm177_vm1, %v773_v49  ;;  %v863_v13 = vmul.f32 %v847_v2, %v1814_v1 }
  0xe6   :  { %1269 = vmatprep.mubr.msk.f32.mxu0 %vm48_vm0, %v1966_v51  ;;  %1281 = vmatprep.mubr.msk.f32.mxu1 %vm48_vm0, %v847_v2  ;;  %v900_v51 = vsel %vm48_vm0, %v862_v12, 0.0  ;;  %v906_v8 = vsel %vm48_vm0, %v864_v55, 0.0 }
  0xe7   :  { %v850_v16 = vld [vmem:[#allocation2 + $0x78] sm:$0xff]  ;;  %v903_v54 = vsel %vm48_vm0, %v863_v13, 0.0  ;;  %v717_v13 = vld [vmem:[#allocation3] sm:$0xff] }
  0xe8   :  { %889 = vadd.xlane.f32.xlu1 %v888_v46  ;;  %v2031_v3 = vld [vmem:[#allocation2 + $0x70] sm:$0xff]  ;;  %v866_v56 = vmul.f32 %v850_v16, %v1783_v25 }
  0xe9   :  { %1270 = vmatmul.mubr.msk.f32.gmra.mxu0 %vm48_vm0, %v840_v41  ;;  %1282 = vmatmul.mubr.msk.f32.gmra.mxu1 %vm48_vm0, %v848_v44  ;;  %v865_v35 = vmul.f32 %v2031_v3, %v1794_v0 }
  0xea   :  { %1272 = vmatprep.mubr.msk.f32.mxu0 %vm48_vm0, %v841_v31  ;;  %1284 = vmatprep.mubr.msk.f32.mxu1 %vm48_vm0, %v2031_v3  ;;  %v912_v57 = vsel %vm48_vm0, %v866_v56, 0.0 }
  0xeb   :  { %v909_v28 = vsel %vm48_vm0, %v865_v35, 0.0  ;;  %v728_v35 = vld [vmem:[#allocation3 + $0x58] sm:$0xff] }
  0xec   :  { %892 = vadd.xlane.f32.xlu1 %v891_v4 }
  0xed   :  { %1273 = vmatmul.mubr.msk.f32.gmra.mxu0 %vm48_vm0, %v842_v36  ;;  %1285 = vmatmul.mubr.msk.f32.gmra.mxu1 %vm48_vm0, %v850_v16 }
  0xf0   :  { %895 = vadd.xlane.f32.xlu1 %v894_v29 }
  0xf4   :  { %898 = vadd.xlane.f32.xlu1 %v897_v9 }
  0xf8   :  { %901 = vadd.xlane.f32.xlu1 %v900_v51 }
  0xfc   :  { %904 = vadd.xlane.f32.xlu1 %v903_v54 }
 0x100   :  { %907 = vadd.xlane.f32.xlu1 %v906_v8 }
 0x104   :  { %913 = vadd.xlane.f32.xlu1 %v912_v57  ;;  %v1045_v57 = vld [vmem:[#allocation3 + $0x8] sm:$0xff] }
 0x155   :  { %v872_v38 = vpop.xlane.xlu1 %871  ;;  %v869_v2 = vpop.xlane.xlu0 %868 }
 0x156   :  { %v916_v46 = vmul.f32 0.06666667, %v872_v38  ;;  %v915_v0 = vmul.f32 0.06666667, %v869_v2 }
 0x158   :  { %v932_v44 = vmax.f32 %v916_v46, 0.0  ;;  %v931_v3 = vmax.f32 %v915_v0, 0.0 }
 0x15a   :  { %v948_v4 = vadd.f32 1.0, %v932_v44  ;;  %v947_v16 = vadd.f32 1.0, %v931_v3  ;;  %v729_v3 = vld [vmem:[#allocation3 + $0x60] sm:$0xff] }
 0x15d   :  { %v875_v47 = vpop.xlane.xlu1 %874 }
 0x15e   :  { %v917_v45 = vmul.f32 0.06666667, %v875_v47 }
 0x160   :  { %v933_v53 = vmax.f32 %v917_v45, 0.0 }
 0x161   :  { %v878_v39 = vpop.xlane.xlu1 %877 }
 0x162   :  { %v918_v48 = vmul.f32 0.06666667, %v878_v39  ;;  %v949_v29 = vadd.f32 1.0, %v933_v53 }
 0x164   :  { %v934_v17 = vmax.f32 %v918_v48, 0.0 }
 0x165   :  { %v881_v27 = vpop.xlane.xlu1 %880 }
 0x166   :  { %v919_v9 = vmul.f32 0.06666667, %v881_v27  ;;  %v950_v54 = vadd.f32 1.0, %v934_v17 }
 0x168   :  { %v935_v55 = vmax.f32 %v919_v9, 0.0  ;;  %v1052_v9 = vld [vmem:[#allocation3 + $0x40] sm:$0xff] }
 0x169   :  { %v884_v40 = vpop.xlane.xlu1 %883 }
 0x16a   :  { %v920_v51 = vmul.f32 0.06666667, %v884_v40 }
 0x16d   :  { %v887_v42 = vpop.xlane.xlu1 %886 }
 0x171   :  { %v890_v52 = vpop.xlane.xlu1 %889 }
 0x1a1   :  { %v1265_v6 = vpop.f32.mrf.mxu0  ;;  %v1277_v60 = vpop.f32.mrf.mxu1 }
 0x1a2   :  { %v936_v6 = vmax.f32 %v920_v51, 0.0  ;;  %v921_v60 = vmul.f32 0.06666667, %v887_v42 }
 0x1a3   :  { %v503_v61 = vpop.f32.mrf.mxu0  ;;  %v543_v22 = vpop.f32.mrf.mxu1 }
 0x1a4   :  { %v669_v62 = vmul.f32 1.442695, %v503_v61  ;;  %v726_v61 = vld [vmem:[#allocation3 + $0x48] sm:$0xff]  ;;  %v951_v22 = vadd.f32 1.0, %v935_v55  ;;  %v952_v5 = vadd.f32 1.0, %v936_v6 }
 0x1a5   :  { %v1268_v1 = vpop.f32.mrf.mxu0  ;;  %v1280_v58 = vpop.f32.mrf.mxu1 }
 0x1a6   :  { %1391 = vpow2.f32 %v669_v62 }
 0x1a7   :  { %v513_v20 = vpop.f32.mrf.mxu0  ;;  %v553_v37 = vpop.f32.mrf.mxu1 }
 0x1a8   :  { %v1061_v20 = vadd.f32 1.0, %v1045_v57  ;;  %v922_v37 = vmul.f32 0.06666667, %v890_v52 }
 0x1a9   :  { %v1271_v41 = vpop.f32.mrf.mxu0  ;;  %v1283_v21 = vpop.f32.mrf.mxu1 }
 0x1aa   :  { %v1047_v21 = vld [vmem:[#allocation3 + $0x18] sm:$0xff] }
 0x1ab   :  { %v523_v25 = vpop.f32.mrf.mxu0  ;;  %v563_v43 = vpop.f32.mrf.mxu1 }
 0x1ac   :  { %v937_v25 = vmax.f32 %v921_v60, 0.0  ;;  %v727_v43 = vld [vmem:[#allocation3 + $0x50] sm:$0xff] }
 0x1ad   :  { %v1274_v7 = vpop.f32.mrf.mxu0  ;;  %v1286_v10 = vpop.f32.mrf.mxu1 }
 0x1ae   :  { %v1062_v10 = vadd.f32 1.0, %v1046_v63 }
 0x1af   :  { %v533_v11 = vpop.f32.mrf.mxu0  ;;  %v573_v23 = vpop.f32.mrf.mxu1 }
 0x1b3   :  { %v1392_v15 = vpop.eup %1391 }
 0x1b4   :  { %v701_v18 = vsel %vm653_vm4, %v1392_v15, 0.0  ;;  %v1048_v15 = vld [vmem:[#allocation3 + $0x20] sm:$0xff] }
 0x1b5   :  { %733 = vadd.xlane.f32.xlu0 %v701_v18  ;;  %v813_v30 = vrot.slane %v701_v18, 4  ;;  %v1064_v38 = vadd.f32 1.0, %v1048_v15 }
 0x1b7   :  { %v814_v31 = vadd.f32 %v813_v30, %v701_v18  ;;  %v1063_v18 = vadd.f32 1.0, %v1047_v21 }
 0x1b9   :  { %v815_v34 = vrot.slane %v814_v31, 2  ;;  %751 = vadd.xlane.f32.xlu0 %v1469_v50 }
 0x1bb   :  { %v816_v19 = vadd.f32 %v815_v34, %v814_v31  ;;  %v938_v31 = vmax.f32 %v922_v37, 0.0 }
 0x1bd   :  { %v817_v26 = vrot.slane %v816_v19, 1  ;;  %753 = vadd.xlane.f32.xlu0 %v1469_v50  ;;  %v954_v46 = vadd.f32 1.0, %v938_v31 }
 0x1bf   :  { %v818_v24 = vadd.f32 %v817_v26, %v816_v19  ;;  %v1049_v26 = vld [vmem:[#allocation3 + $0x28] sm:$0xff] }
 0x1c0   :  { %v1065_v42 = vadd.f32 1.0, %v1049_v26 }
 0x1c1   :  { %755 = vadd.xlane.f32.xlu0 %v1469_v50  ;;  %v819_v14 = vadd.f32 1.0, %v818_v24  ;;  %v953_v24 = vadd.f32 1.0, %v937_v25 }
 0x1c3   :  { %1393 = vlog2.f32 %v819_v14 }
 0x1c4   :  { %1395 = vlog2.f32 %v948_v4 }
 0x1c5   :  { %757 = vadd.xlane.f32.xlu0 %v1469_v50  ;;  %1397 = vlog2.f32 %v947_v16 }
 0x1c6   :  { %1399 = vlog2.f32 %v949_v29 }
 0x1c7   :  { %1401 = vlog2.f32 %v950_v54 }
 0x1c8   :  { %1403 = vlog2.f32 %v951_v22 }
 0x1c9   :  { %759 = vadd.xlane.f32.xlu0 %v1469_v50  ;;  %1405 = vlog2.f32 %v1061_v20 }
 0x1ca   :  { %1407 = vlog2.f32 %v952_v5 }
 0x1cb   :  { %1409 = vlog2.f32 %v1062_v10 }
 0x1cc   :  { %1411 = vlog2.f32 %v1063_v18 }
 0x1cd   :  { %761 = vadd.xlane.f32.xlu0 %v1469_v50 }
 0x1d0   :  { %v1394_v32 = vpop.eup %1393 }
 0x1d1   :  { %763 = vadd.xlane.f32.xlu0 %v1469_v50  ;;  %v821_v33 = vmul.f32 0.6931472, %v1394_v32  ;;  %v893_v50 = vpop.xlane.xlu1 %892  ;;  %v1396_v1 = vpop.eup %1395 }
 0x1d2   :  { %v1398_v59 = vpop.eup %1397  ;;  %v966_v7 = vmul.f32 0.6931472, %v1396_v1  ;;  %v923_v11 = vmul.f32 0.06666667, %v893_v50  ;;  %v1051_v50 = vld [vmem:[#allocation3 + $0x38] sm:$0xff] }
 0x1d3   :  { %v823_v36 = vsel %vm822_vm5, %v821_v33, 0.0  ;;  %v964_v30 = vmul.f32 0.6931472, %v1398_v59  ;;  %v1050_v33 = vld [vmem:[#allocation3 + $0x30] sm:$0xff]  ;;  %v1400_v47 = vpop.eup %1399 }
 0x1d4   :  { %v939_v39 = vmax.f32 %v923_v11, 0.0  ;;  %v1066_v4 = vadd.f32 1.0, %v1050_v33  ;;  %v968_v45 = vmul.f32 0.6931472, %v1400_v47  ;;  %v1402_v53 = vpop.eup %1401 }
 0x1d5   :  { %910 = vadd.xlane.f32.xlu0 %v909_v28  ;;  %v896_v49 = vpop.xlane.xlu1 %895  ;;  %v996_v28 = vsel %vm177_vm1, %v966_v7, 0.0  ;;  %v995_v2 = vsel %vm177_vm1, %v964_v30, 0.0  ;;  %v970_v60 = vmul.f32 0.6931472, %v1402_v53  ;;  %v1404_v22 = vpop.eup %1403 }
 0x1d6   :  { %v924_v14 = vmul.f32 0.06666667, %v896_v49  ;;  %v955_v48 = vadd.f32 1.0, %v939_v39  ;;  %v998_v6 = vsel %vm177_vm1, %v968_v45, 0.0  ;;  %v1406_v20 = vpop.eup %1405 }
 0x1d7   :  { %v1408_v10 = vpop.eup %1407  ;;  %v1000_v11 = vsel %vm177_vm1, %v970_v60, 0.0 }
 0x1d8   :  { %v940_v0 = vmax.f32 %v924_v14, 0.0  ;;  %v1410_v18 = vpop.eup %1409 }
 0x1d9   :  { %824 = vadd.xlane.f32.xlu0 %v823_v36  ;;  %v899_v12 = vpop.xlane.xlu1 %898  ;;  %v1412_v26 = vpop.eup %1411 }
 0x1da   :  { %v925_v27 = vmul.f32 0.06666667, %v899_v12  ;;  %v997_v12 = vadd.f32 %v996_v28, %v995_v2  ;;  %v956_v54 = vadd.f32 1.0, %v940_v0  ;;  %v974_v28 = vmul.f32 0.6931472, %v1408_v10 }
 0x1dc   :  { %v941_v49 = vmax.f32 %v925_v27, 0.0  ;;  %v999_v59 = vadd.f32 %v998_v6, %v997_v12 }
 0x1dd   :  { %v902_v62 = vpop.xlane.xlu1 %901 }
 0x1de   :  { %v926_v44 = vmul.f32 0.06666667, %v902_v62  ;;  %v957_v62 = vadd.f32 1.0, %v941_v49 }
 0x1e0   :  { %v942_v55 = vmax.f32 %v926_v44, 0.0 }
 0x1e1   :  { %v905_v34 = vpop.xlane.xlu1 %904 }
 0x1e2   :  { %v927_v29 = vmul.f32 0.06666667, %v905_v34  ;;  %v958_v5 = vadd.f32 1.0, %v942_v55 }
 0x1e4   :  { %v943_v1 = vmax.f32 %v927_v29, 0.0 }
 0x1e5   :  { %v908_v16 = vpop.xlane.xlu1 %907 }
 0x1e6   :  { %v959_v30 = vadd.f32 1.0, %v943_v1 }
 0x1e9   :  { %v914_v37 = vpop.xlane.xlu1 %913 }
 0x1ea   :  { %v930_v31 = vmul.f32 0.06666667, %v914_v37 }
 0x23e   :  { %v734_v8 = vpop.xlane.xlu0 %733 }
 0x23f   :  { %v765_v56 = vadd.f32 %v734_v8, %v717_v13  ;;  %v1067_v13 = vadd.f32 1.0, %v1051_v50  ;;  %v928_v8 = vmul.f32 0.06666667, %v908_v16  ;;  %v1083_v50 = vmul.f32 0.6931472, %v1412_v26 }
 0x240   :  { %v1004_v16 = vsel %vm177_vm1, %v974_v28, 0.0 }
 0x241   :  { %782 = vst.msk [vmem:[#allocation3] sm:$0xff] %vm177_vm1, %v765_v56  ;;  %v730_v56 = vld [vmem:[#allocation3 + $0x68] sm:$0xff]  ;;  %v944_v25 = vmax.f32 %v928_v8, 0.0  ;;  %v1113_v6 = vsel %vm177_vm1, %v1083_v50, 0.0 }
 0x242   :  { %v752_v58 = vpop.xlane.xlu0 %751 }
 0x243   :  { %v774_v41 = vadd.f32 %v752_v58, %v726_v61  ;;  %v1068_v61 = vadd.f32 1.0, %v1052_v9  ;;  %v960_v33 = vadd.f32 1.0, %v944_v25 }
 0x245   :  { %791 = vst.msk [vmem:[#allocation3 + $0x48] sm:$0xff] %vm177_vm1, %v774_v41 }
 0x246   :  { %v754_v23 = vpop.xlane.xlu0 %753 }
 0x247   :  { %v775_v19 = vadd.f32 %v754_v23, %v727_v43  ;;  %v731_v43 = vld [vmem:[#allocation3 + $0x70] sm:$0xff]  ;;  %v972_v23 = vmul.f32 0.6931472, %v1404_v22 }
 0x248   :  { %v1044_v32 = vld [vmem:[#allocation3] sm:$0xff] }
 0x249   :  { %792 = vst.msk [vmem:[#allocation3 + $0x50] sm:$0xff] %vm177_vm1, %v775_v19  ;;  %v1060_v36 = vadd.f32 1.0, %v1044_v32  ;;  %v1079_v19 = vmul.f32 0.6931472, %v1406_v20  ;;  %v1001_v32 = vadd.f32 %v1000_v11, %v999_v59  ;;  %v1002_v2 = vsel %vm177_vm1, %v972_v23, 0.0 }
 0x24a   :  { %v756_v40 = vpop.xlane.xlu0 %755 }
 0x24b   :  { %v776_v52 = vadd.f32 %v756_v40, %v728_v35  ;;  %1413 = vlog2.f32 %v1060_v36  ;;  %v732_v36 = vld [vmem:[#allocation3 + $0x78] sm:$0xff]  ;;  %v1081_v40 = vmul.f32 0.6931472, %v1410_v18  ;;  %v1109_v0 = vsel %vm177_vm1, %v1079_v19, 0.0 }
 0x24c   :  { %1415 = vlog2.f32 %v953_v24  ;;  %v1053_v57 = vld [vmem:[#allocation3 + $0x48] sm:$0xff] }
 0x24d   :  { %793 = vst.msk [vmem:[#allocation3 + $0x58] sm:$0xff] %vm177_vm1, %v776_v52  ;;  %1417 = vlog2.f32 %v1064_v38  ;;  %v1069_v21 = vadd.f32 1.0, %v1053_v57  ;;  %v1111_v12 = vsel %vm177_vm1, %v1081_v40, 0.0 }
 0x24e   :  { %v758_v17 = vpop.xlane.xlu0 %757  ;;  %1419 = vlog2.f32 %v1065_v42 }
 0x24f   :  { %1421 = vlog2.f32 %v954_v46  ;;  %v777_v51 = vadd.f32 %v758_v17, %v729_v3  ;;  %v946_v46 = vmax.f32 %v930_v31, 0.0 }
 0x250   :  { %1423 = vlog2.f32 %v1066_v4  ;;  %v1054_v63 = vld [vmem:[#allocation3 + $0x50] sm:$0xff] }
 0x251   :  { %794 = vst.msk [vmem:[#allocation3 + $0x60] sm:$0xff] %vm177_vm1, %v777_v51  ;;  %1425 = vlog2.f32 %v955_v48  ;;  %v1070_v15 = vadd.f32 1.0, %v1054_v63  ;;  %v1003_v51 = vadd.f32 %v1002_v2, %v1001_v32 }
 0x252   :  { %v760_v58 = vpop.xlane.xlu0 %759  ;;  %1427 = vlog2.f32 %v1067_v13  ;;  %v962_v13 = vadd.f32 1.0, %v946_v46 }
 0x253   :  { %v778_v41 = vadd.f32 %v760_v58, %v730_v56  ;;  %1429 = vlog2.f32 %v956_v54 }
 0x254   :  { %v1055_v7 = vld [vmem:[#allocation3 + $0x58] sm:$0xff]  ;;  %1431 = vlog2.f32 %v1068_v61  ;;  %v1005_v61 = vadd.f32 %v1004_v16, %v1003_v51 }
 0x255   :  { %795 = vst.msk [vmem:[#allocation3 + $0x68] sm:$0xff] %vm177_vm1, %v778_v41  ;;  %1433 = vlog2.f32 %v957_v62  ;;  %v1071_v14 = vadd.f32 1.0, %v1055_v7 }
 0x256   :  { %v762_v34 = vpop.xlane.xlu0 %761  ;;  %1435 = vlog2.f32 %v1069_v21 }
 0x257   :  { %v779_v24 = vadd.f32 %v762_v34, %v731_v43  ;;  %1437 = vlog2.f32 %v958_v5 }
 0x258   :  { %v1414_v35 = vpop.eup %1413  ;;  %v1056_v38 = vld [vmem:[#allocation3 + $0x60] sm:$0xff]  ;;  %1439 = vlog2.f32 %v1070_v15 }
 0x259   :  { %v1416_v47 = vpop.eup %1415  ;;  %796 = vst.msk [vmem:[#allocation3 + $0x70] sm:$0xff] %vm177_vm1, %v779_v24  ;;  %v1072_v39 = vadd.f32 1.0, %v1056_v38  ;;  %v1077_v27 = vmul.f32 0.6931472, %v1414_v35  ;;  %1441 = vlog2.f32 %v959_v30 }
 0x25a   :  { %v1418_v42 = vpop.eup %1417  ;;  %v764_v52 = vpop.xlane.xlu0 %763  ;;  %1443 = vlog2.f32 %v1071_v14  ;;  %v976_v53 = vmul.f32 0.6931472, %v1416_v47 }
 0x25b   :  { %v1420_v44 = vpop.eup %1419  ;;  %v780_v3 = vadd.f32 %v764_v52, %v732_v36  ;;  %v1108_v4 = vsel %vm177_vm1, %v1077_v27, 0.0  ;;  %1445 = vlog2.f32 %v960_v33  ;;  %v1085_v9 = vmul.f32 0.6931472, %v1418_v42 }
 0x25c   :  { %v1422_v45 = vpop.eup %1421  ;;  %v1057_v48 = vld [vmem:[#allocation3 + $0x68] sm:$0xff]  ;;  %v1110_v49 = vadd.f32 %v1109_v0, %v1108_v4  ;;  %1447 = vlog2.f32 %v1072_v39  ;;  %v1087_v55 = vmul.f32 0.6931472, %v1420_v44  ;;  %v1006_v20 = vsel %vm177_vm1, %v976_v53, 0.0 }
 0x25d   :  { %v1424_v29 = vpop.eup %1423  ;;  %797 = vst.msk [vmem:[#allocation3 + $0x78] sm:$0xff] %vm177_vm1, %v780_v3  ;;  %v1073_v17 = vadd.f32 1.0, %v1057_v48  ;;  %v978_v22 = vmul.f32 0.6931472, %v1422_v45  ;;  %v1115_v21 = vsel %vm177_vm1, %v1085_v9, 0.0  ;;  %v1007_v33 = vadd.f32 %v1006_v20, %v1005_v61 }
 0x25e   :  { %v911_v54 = vpop.xlane.xlu0 %910  ;;  %v1112_v8 = vadd.f32 %v1111_v12, %v1110_v49  ;;  %v1426_v56 = vpop.eup %1425  ;;  %v1089_v1 = vmul.f32 0.6931472, %v1424_v29  ;;  %v1117_v7 = vsel %vm177_vm1, %v1087_v55, 0.0 }
 0x25f   :  { %v929_v57 = vmul.f32 0.06666667, %v911_v54  ;;  %1449 = vlog2.f32 %v1073_v17  ;;  %v1428_v60 = vpop.eup %1427  ;;  %v980_v5 = vmul.f32 0.6931472, %v1426_v56  ;;  %v1008_v30 = vsel %vm177_vm1, %v978_v22, 0.0 }
 0x260   :  { %v1058_v62 = vld [vmem:[#allocation3 + $0x70] sm:$0xff]  ;;  %v1114_v58 = vadd.f32 %v1113_v6, %v1112_v8  ;;  %v1430_v63 = vpop.eup %1429  ;;  %1451 = vlog2.f32 %v962_v13  ;;  %v1091_v15 = vmul.f32 0.6931472, %v1428_v60  ;;  %v1119_v26 = vsel %vm177_vm1, %v1089_v1, 0.0 }
 0x261   :  { %v945_v37 = vmax.f32 %v929_v57, 0.0  ;;  %v1074_v41 = vadd.f32 1.0, %v1058_v62  ;;  %v1432_v59 = vpop.eup %1431  ;;  %v982_v31 = vmul.f32 0.6931472, %v1430_v63  ;;  %v1010_v36 = vsel %vm177_vm1, %v980_v5, 0.0 }
 0x262   :  { %v825_v25 = vpop.xlane.xlu0 %824  ;;  %v1116_v43 = vadd.f32 %v1115_v21, %v1114_v58  ;;  %v1434_v10 = vpop.eup %1433  ;;  %v1093_v32 = vmul.f32 0.6931472, %v1432_v59  ;;  %v1121_v42 = vsel %vm177_vm1, %v1091_v15, 0.0  ;;  %v1009_v46 = vadd.f32 %v1008_v30, %v1007_v33 }
 0x263   :  { %v961_v11 = vadd.f32 1.0, %v945_v37  ;;  %v826_v23 = vrot.slane %v825_v25, 4  ;;  %1453 = vlog2.f32 %v1074_v41  ;;  %v1436_v18 = vpop.eup %1435  ;;  %v984_v38 = vmul.f32 0.6931472, %v1434_v10 }
 0x264   :  { %v1059_v34 = vld [vmem:[#allocation3 + $0x78] sm:$0xff]  ;;  %v1118_v19 = vadd.f32 %v1117_v7, %v1116_v43  ;;  %v1438_v24 = vpop.eup %1437  ;;  %v1095_v40 = vmul.f32 0.6931472, %v1436_v18  ;;  %v1012_v3 = vsel %vm177_vm1, %v982_v31, 0.0  ;;  %v1123_v45 = vsel %vm177_vm1, %v1093_v32, 0.0 }
 0x265   :  { %1455 = vlog2.f32 %v961_v11  ;;  %v827_v14 = vadd.f32 %v826_v23, %v825_v25  ;;  %v1075_v35 = vadd.f32 1.0, %v1059_v34  ;;  %v1440_v28 = vpop.eup %1439  ;;  %v986_v52 = vmul.f32 0.6931472, %v1438_v24 }
 0x266   :  { %v1120_v47 = vadd.f32 %v1119_v26, %v1118_v19  ;;  %v1442_v39 = vpop.eup %1441  ;;  %v1097_v4 = vmul.f32 0.6931472, %v1440_v28  ;;  %v1011_v53 = vadd.f32 %v1010_v36, %v1009_v46  ;;  %v1014_v48 = vsel %vm177_vm1, %v984_v38, 0.0 }
 0x267   :  { %v828_v27 = vrot.slane %v827_v14, 2  ;;  %1457 = vlog2.f32 %v1075_v35  ;;  %v1444_v2 = vpop.eup %1443  ;;  %v988_v29 = vmul.f32 0.6931472, %v1442_v39  ;;  %v1125_v12 = vsel %vm177_vm1, %v1095_v40, 0.0 }
 0x268   :  { %v1122_v0 = vadd.f32 %v1121_v42, %v1120_v47  ;;  %v1446_v44 = vpop.eup %1445  ;;  %v1099_v9 = vmul.f32 0.6931472, %v1444_v2  ;;  %v1013_v13 = vadd.f32 %v1012_v3, %v1011_v53  ;;  %v1016_v54 = vsel %vm177_vm1, %v986_v52, 0.0 }
 0x269   :  { %v829_v50 = vadd.f32 %v828_v27, %v827_v14  ;;  %v1448_v16 = vpop.eup %1447  ;;  %v990_v8 = vmul.f32 0.6931472, %v1446_v44  ;;  %v1127_v6 = vsel %vm177_vm1, %v1097_v4, 0.0  ;;  %v1018_v62 = vsel %vm177_vm1, %v988_v29, 0.0 }
 0x26a   :  { %v1124_v49 = vadd.f32 %v1123_v45, %v1122_v0  ;;  %v1101_v57 = vmul.f32 0.6931472, %v1448_v16  ;;  %v1015_v60 = vadd.f32 %v1014_v48, %v1013_v13  ;;  %v1129_v58 = vsel %vm177_vm1, %v1099_v9, 0.0 }
 0x26b   :  { %v830_v17 = vrot.slane %v829_v50, 1  ;;  %v1020_v59 = vsel %vm177_vm1, %v990_v8, 0.0 }
 0x26c   :  { %v1450_v51 = vpop.eup %1449  ;;  %v1126_v55 = vadd.f32 %v1125_v12, %v1124_v49  ;;  %v1017_v20 = vadd.f32 %v1016_v54, %v1015_v60  ;;  %v1131_v21 = vsel %vm177_vm1, %v1101_v57, 0.0 }
 0x26d   :  { %v831_v56 = vadd.f32 %v830_v17, %v829_v50  ;;  %v1452_v22 = vpop.eup %1451  ;;  %v1103_v1 = vmul.f32 0.6931472, %v1450_v51 }
 0x26e   :  { %v1128_v61 = vadd.f32 %v1127_v6, %v1126_v55  ;;  %v1019_v43 = vadd.f32 %v1018_v62, %v1017_v20  ;;  %v994_v11 = vmul.f32 0.6931472, %v1452_v22 }
 0x26f   :  { %1319 = vpush %v831_v56  ;;  %v1133_v10 = vsel %vm177_vm1, %v1103_v1, 0.0 }
 0x270   :  { %v1454_v63 = vpop.eup %1453  ;;  %v1130_v37 = vadd.f32 %v1129_v58, %v1128_v61  ;;  %v1021_v18 = vadd.f32 %v1020_v59, %v1019_v43  ;;  %v1024_v14 = vsel %vm177_vm1, %v994_v11, 0.0 }
 0x271   :  { %v1105_v41 = vmul.f32 0.6931472, %v1454_v63 }
 0x272   :  { %v1456_v5 = vpop.eup %1455  ;;  %v1132_v25 = vadd.f32 %v1131_v21, %v1130_v37 }
 0x273   :  { %v992_v7 = vmul.f32 0.6931472, %v1456_v5  ;;  %v1135_v31 = vsel %vm177_vm1, %v1105_v41, 0.0 }
 0x274   :  { %v1458_v23 = vpop.eup %1457  ;;  %v1134_v15 = vadd.f32 %v1133_v10, %v1132_v25 }
 0x275   :  { %v1107_v30 = vmul.f32 0.6931472, %v1458_v23  ;;  %v1022_v34 = vsel %vm177_vm1, %v992_v7, 0.0 }
 0x276   :  { %v1136_v19 = vadd.f32 %v1135_v31, %v1134_v15  ;;  %v1023_v26 = vadd.f32 %v1022_v34, %v1021_v18 }
 0x277   :  { %v1137_v24 = vsel %vm177_vm1, %v1107_v30, 0.0 }
 0x278   :  { %v1138_v35 = vadd.f32 %v1137_v24, %v1136_v19  ;;  %v1025_v32 = vadd.f32 %v1024_v14, %v1023_v26 }
 0x27a   :  { %1139 = vadd.xlane.f32.xlu0 %v1138_v35  ;;  %1026 = vadd.xlane.f32.xlu1 %v1025_v32 }
 0x2a0   :  { %s1320_s0 = spop %1319 }
 0x2a1   :  { %s833_s16 = smul.f32 0.06666667, %s1320_s0 }
 0x303   :  { %v1027_v28 = vpop.xlane.xlu1 %1026  ;;  %v1140_v33 = vpop.xlane.xlu0 %1139 }
 0x304   :  { %v1028_v36 = vrot.slane %v1027_v28, 4  ;;  %v1141_v38 = vrot.slane %v1140_v33, 4 }
 0x306   :  { %v1029_v47 = vadd.f32 %v1028_v36, %v1027_v28  ;;  %v1142_v39 = vadd.f32 %v1141_v38, %v1140_v33 }
 0x308   :  { %v1030_v27 = vrot.slane %v1029_v47, 2  ;;  %v1143_v40 = vrot.slane %v1142_v39, 2 }
 0x30a   :  { %v1031_v42 = vadd.f32 %v1030_v27, %v1029_v47  ;;  %v1144_v2 = vadd.f32 %v1143_v40, %v1142_v39 }
 0x30c   :  { %v1032_v46 = vrot.slane %v1031_v42, 1  ;;  %v1145_v52 = vrot.slane %v1144_v2, 1 }
 0x30e   :  { %v1033_v0 = vadd.f32 %v1032_v46, %v1031_v42  ;;  %v1146_v44 = vadd.f32 %v1145_v52, %v1144_v2 }
 0x310   :  { %1321 = vpush %v1033_v0 }
 0x311   :  { %1323 = vpush %v1146_v44 }
 0x341   :  { %s1322_s17 = spop %1321 }
 0x342   :  { %s1035_s18 = smul.f32 -10.0, %s1322_s17  ;;  %s1324_s19 = spop %1323 }
 0x343   :  { %s1148_s20 = smul.f32 0.06666667, %s1324_s19 }
 0x344   :  { %s1038_s1 = sadd.f32 %s1035_s18, %s833_s16 }
 0x346   :  { %s1150_s21 = sadd.f32 %s1148_s20, %s1038_s1 }
 0x348   :  { %s1151_s22 = smul.f32 0.125, %s1150_s21 }
 0x34a   :  { %1153 = sst [smem:[#allocation5]] %s1151_s22 }
 0x34b   :  { %1161 = dma.smem_to_hbm %s1470_s23, 16, %s2107_s2, [#allocation6]  }
 0x34c   :  { %1467 = dma.done.wait [#allocation6], 16  }
 0x34d   :  { %1468 = vsyncadd [#allocation6], 4294967280 }
 0x34e   :  { %1165 = sfence }
 0x34f   :  { %1166 = vsyncpa [#allocation6], 1 }

</bundles_post_ra>
